<compile_context>
chip_gen: v5e
topology: v5e:2x2
jax: 0.10.0
libtpu: 0.0.40
codegen_flags: <defaults>
</compile_context>

<pallas_src>
import functools

import jax
import jax.numpy as jnp
from jax import lax
from jax.experimental import pallas as pl
from jax.experimental.pallas import tpu as pltpu

LANE = 128            # all channel dims zero-padded to multiples of this
TM = 128              # row tile for the tiled path
                      # TODO(synk): raise TM to 256 on v6e/v7x (256x256 MXU) after a VMEM re-check.
FUSE_MAX_NODES = 128  # graphs with <= this many nodes use the single fused call
NEG_INF = -1e30       # additive key-padding bias (kept in f32; never cast to bf16)


def _round_up(n, m):
    return (n + m - 1) // m * m


def _const_spec(shape):
    """Full-array, constant-index input block, single-buffered (it never changes
    across grid steps, so double-buffering would only waste VMEM)."""
    n = len(shape)
    return pl.BlockSpec(shape, lambda i, _n=n: (0,) * _n,
                        pipeline_mode=pl.Buffered(1))


def _vmem_limit(*arrays, extra_bytes=0):
    """Explicit scoped-VMEM budget: 2x operand bytes + scratch + headroom."""
    total = sum(int(a.size) * a.dtype.itemsize for a in arrays)
    est = 2 * total + int(extra_bytes) + (8 << 20)
    return int(min(64 << 20, max(16 << 20, est)))


def _mm(x, w):
    """bf16 MXU matmul with f32 accumulation."""
    return jnp.dot(x.astype(jnp.bfloat16), w.astype(jnp.bfloat16),
                   preferred_element_type=jnp.float32)


# ----------------------------- Pallas kernels -----------------------------

def _gps_block(h, h_bf, a, kv_or_qkv, kbias, lane,
               gw1, gb1, gw2, gb2, wq, bq, wo, bo, fw1, fb1, fw2, fb2, bn,
               *, heads, dh, qkp, scale, fused_qkv):
    """One GPSConv block on a row slab `h` (f32) / `h_bf` (bf16).

    fused_qkv=True  : kv_or_qkv is the (CP, 3*QKP) fused W_qkv weight ref value
                      and q/k/v are all computed here from h_bf (single-tile path).
    fused_qkv=False : kv_or_qkv is the precomputed (Npad, 2*QKP) bf16 K|V slab
                      (hoisted per-layer projection); only Q is computed here.
    """
    # ---- local GINConv (eps=0) + residual + folded BatchNorm1 ----
    agg = jnp.dot(a, h_bf, preferred_element_type=jnp.float32)
    g = jnp.maximum(_mm(agg + h, gw1) + gb1, 0.0)
    g = _mm(g, gw2) + gb2
    h_local = (g + h) * bn[0:1] + bn[1:2]

    # ---- global MultiheadAttention (heads packed into one 128-lane block) ----
    if fused_qkv:
        qkv = jnp.dot(h_bf, kv_or_qkv, preferred_element_type=jnp.float32) + bq
        q = qkv[:, 0:qkp]
        k = qkv[:, qkp:2 * qkp].astype(jnp.bfloat16)
        v = qkv[:, 2 * qkp:3 * qkp].astype(jnp.bfloat16)
    else:
        q = _mm(h, wq) + bq                       # (TM, QKP) from the f32 row tile
        k = kv_or_qkv[:, 0:qkp]                   # (Npad, QKP) bf16, hoisted
        v = kv_or_qkv[:, qkp:2 * qkp]             # (Npad, QKP) bf16, hoisted

    attn = jnp.zeros_like(q)
    for hd in range(heads):                       # heads is tiny & static
        hmask = ((lane >= hd * dh) & (lane < (hd + 1) * dh)).astype(jnp.float32)
        qh = (q * hmask).astype(jnp.bfloat16)     # zero other heads -> per-head dot
        s = lax.dot_general(qh, k, (((1,), (1,)), ((), ())),
                            preferred_element_type=jnp.float32) * scale + kbias
        s = s - jnp.max(s, axis=-1, keepdims=True)
        p = jnp.exp(s)
        p = p * pl.reciprocal(jnp.sum(p, axis=-1, keepdims=True), approx=True)
        attn = attn + hmask * jnp.dot(p.astype(jnp.bfloat16), v,
                                      preferred_element_type=jnp.float32)
    at = _mm(attn, wo) + bo
    h_attn = (at + h) * bn[2:3] + bn[3:4]

    # ---- combine + feed-forward + folded BatchNorm3 ----
    comb = h_local + h_attn
    m = jnp.maximum(_mm(comb, fw1) + fb1, 0.0)
    m = _mm(m, fw2) + fb2
    return (comb + m) * bn[4:5] + bn[5:6]


def _fused_forward_kernel(x_ref, a_ref, kb_ref, p_ref, nodew_ref, nodeb_ref,
                          gw1_ref, gb1_ref, gw2_ref, gb2_ref,
                          wqkv_ref, bqkv_ref, wo_ref, bo_ref,
                          fw1_ref, fb1_ref, fw2_ref, fb2_ref, bn_ref,
                          rw1_ref, rb1_ref, rw2_ref, rb2_ref, rw3_ref, rb3_ref,
                          o_ref, *, num_layers, heads, dh, qkp, scale):
    """Whole forward (tiny-graph path): node_emb + all layers + pool + MLP."""
    a = a_ref[...]                                     # (Npad, Npad) bf16
    kbias = kb_ref[...]                                # (1, Npad) additive mask
    lane = lax.broadcasted_iota(jnp.int32, (1, qkp), 1)

    h = _mm(x_ref[...], nodew_ref[...]) + nodeb_ref[...]
    for l in range(num_layers):
        h_bf = h.astype(jnp.bfloat16)
        h = _gps_block(h, h_bf, a, wqkv_ref[l], kbias, lane,
                       gw1_ref[l], gb1_ref[l], gw2_ref[l], gb2_ref[l],
                       None, bqkv_ref[l], wo_ref[l], bo_ref[l],
                       fw1_ref[l], fb1_ref[l], fw2_ref[l], fb2_ref[l], bn_ref[l],
                       heads=heads, dh=dh, qkp=qkp, scale=scale, fused_qkv=True)

    pooled = jnp.dot(p_ref[...], h.astype(jnp.bfloat16),
                     preferred_element_type=jnp.float32)        # global_add_pool
    y = jnp.maximum(_mm(pooled, rw1_ref[...]) + rb1_ref[...], 0.0)
    y = jnp.maximum(_mm(y, rw2_ref[...]) + rb2_ref[...], 0.0)
    o_ref[...] = (_mm(y, rw3_ref[...]) + rb3_ref[...]).astype(o_ref.dtype)


def _node_emb_kernel(x_ref, w_ref, b_ref, o32_ref, o16_ref):
    h = _mm(x_ref[...], w_ref[...]) + b_ref[...]
    o32_ref[...] = h
    o16_ref[...] = h.astype(jnp.bfloat16)


def _kv_proj_kernel(h16_ref, w_ref, b_ref, kv_ref):
    kv = jnp.dot(h16_ref[...], w_ref[...], preferred_element_type=jnp.float32)
    kv_ref[...] = (kv + b_ref[...]).astype(jnp.bfloat16)


def _gps_layer_kernel(a_ref, hfull_ref, hrow_ref, kv_ref, kb_ref,
                      gw1_ref, gb1_ref, gw2_ref, gb2_ref,
                      wq_ref, bq_ref, wo_ref, bo_ref,
                      fw1_ref, fb1_ref, fw2_ref, fb2_ref, bn_ref,
                      o32_ref, o16_ref, *, heads, dh, qkp, scale):
    """One GPSConv block for a (TM, CP) row tile (multi-tile graphs)."""
    h_full = hfull_ref[...]          # (Npad, CP) bf16 : all nodes (agg operand)
    h_row = hrow_ref[...]            # (TM, CP)  f32  : this tile (residual / Q)
    lane = lax.broadcasted_iota(jnp.int32, (1, qkp), 1)
    # TODO(synk): flash-style KV/agg chunk loop (online softmax) so VMEM stays
    # bounded on v7x (64 MiB) for graphs beyond ~16K nodes.
    out = _gps_block(h_row, h_full, a_ref[...], kv_ref[...], kb_ref[...], lane,
                     gw1_ref[...], gb1_ref[...], gw2_ref[...], gb2_ref[...],
                     wq_ref[...], bq_ref[...], wo_ref[...], bo_ref[...],
                     fw1_ref[...], fb1_ref[...], fw2_ref[...], fb2_ref[...],
                     bn_ref[...],
                     heads=heads, dh=dh, qkp=qkp, scale=scale, fused_qkv=False)
    o32_ref[...] = out
    o16_ref[...] = out.astype(jnp.bfloat16)


def _pool_readout_kernel(p_ref, h16_ref, w1_ref, b1_ref, w2_ref, b2_ref,
                         w3_ref, b3_ref, o_ref):
    pooled = jnp.dot(p_ref[...], h16_ref[...], preferred_element_type=jnp.float32)
    y = jnp.maximum(_mm(pooled, w1_ref[...]) + b1_ref[...], 0.0)
    y = jnp.maximum(_mm(y, w2_ref[...]) + b2_ref[...], 0.0)
    o_ref[...] = (_mm(y, w3_ref[...]) + b3_ref[...]).astype(o_ref.dtype)


# ----------------------------- kernel wrappers -----------------------------

def fused_forward(params, xp, A, kbias, P, *, heads, dh, qkp):
    cfg = params["cfg"]
    L, R = params["layers"], params["readout"]
    Npad = xp.shape[0]
    Bp = P.shape[0]
    OP = R["w3"].shape[1]
    kern = functools.partial(_fused_forward_kernel, num_layers=cfg["num_layers"],
                             heads=heads, dh=dh, qkp=qkp, scale=float(dh) ** -0.5)
    operands = (xp, A, kbias, P, params["node_w"], params["node_b"],
                L["gw1"], L["gb1"], L["gw2"], L["gb2"],
                L["wqkv"], L["bqkv"], L["wo"], L["bo"],
                L["fw1"], L["fb1"], L["fw2"], L["fb2"], L["bn"],
                R["w1"], R["b1"], R["w2"], R["b2"], R["w3"], R["b3"])
    extra = heads * Npad * Npad * 4 + Npad * 4 * qkp * 4   # score / qkv scratch
    return pl.pallas_call(
        kern,
        out_shape=jax.ShapeDtypeStruct((Bp, OP), jnp.float32),
        grid=(1,),
        in_specs=[_const_spec(op.shape) for op in operands],
        out_specs=pl.BlockSpec((Bp, OP), lambda i: (0, 0)),
        compiler_params=pltpu.CompilerParams(
            dimension_semantics=("arbitrary",),
            vmem_limit_bytes=_vmem_limit(*operands, extra_bytes=extra)),
    )(*operands)
    # TODO(synk): on v7x a single-tile graph uses only one of the two TensorCores;
    # split heads / FF across cores via core_map if this regime matters there.


def node_emb(xp, w, b):
    Npad, DinP = xp.shape
    CP = w.shape[1]
    return pl.pallas_call(
        _node_emb_kernel,
        out_shape=(jax.ShapeDtypeStruct((Npad, CP), jnp.float32),
                   jax.ShapeDtypeStruct((Npad, CP), jnp.bfloat16)),
        grid=(Npad // TM,),
        in_specs=[pl.BlockSpec((TM, DinP), lambda i: (i, 0)),
                  _const_spec((DinP, CP)), _const_spec((1, CP))],
        out_specs=(pl.BlockSpec((TM, CP), lambda i: (i, 0)),
                   pl.BlockSpec((TM, CP), lambda i: (i, 0))),
        compiler_params=pltpu.CompilerParams(
            dimension_semantics=("parallel",),
            vmem_limit_bytes=_vmem_limit(xp, w, b)),
    )(xp, w, b)


def kv_proj(h16, wkv, bkv):
    """Hoisted K/V projection: computed ONCE per layer (not per row tile)."""
    Npad, CP = h16.shape
    KVP = wkv.shape[1]
    return pl.pallas_call(
        _kv_proj_kernel,
        out_shape=jax.ShapeDtypeStruct((Npad, KVP), jnp.bfloat16),
        grid=(Npad // TM,),
        in_specs=[pl.BlockSpec((TM, CP), lambda i: (i, 0)),
                  _const_spec((CP, KVP)), _const_spec((1, KVP))],
        out_specs=pl.BlockSpec((TM, KVP), lambda i: (i, 0)),
        compiler_params=pltpu.CompilerParams(
            dimension_semantics=("parallel",),
            vmem_limit_bytes=_vmem_limit(h16, wkv, bkv)),
    )(h16, wkv, bkv)


def gps_layer(A, h16, h32, kv, kbias, lw, *, heads, dh, qkp):
    Npad, CP = h16.shape
    FP = lw["fw1"].shape[1]
    kern = functools.partial(_gps_layer_kernel, heads=heads, dh=dh, qkp=qkp,
                             scale=float(dh) ** -0.5)
    operands = (A, h16, h32, kv, kbias,
                lw["gw1"], lw["gb1"], lw["gw2"], lw["gb2"],
                lw["wq"], lw["bq"], lw["wo"], lw["bo"],
                lw["fw1"], lw["fb1"], lw["fw2"], lw["fb2"], lw["bn"])
    in_specs = [
        pl.BlockSpec((TM, Npad), lambda i: (i, 0)),   # A row stripe (streamed, bf16)
        _const_spec((Npad, CP)),                      # h_full bf16 (resident, 1-buffered)
        # f32 row tile kept as its own stream so the residual path stays f32
        # while the resident h_full is bf16 (review items 1 & 4 > item 10).
        pl.BlockSpec((TM, CP), lambda i: (i, 0)),     # h_row f32 (residual / Q)
        _const_spec((Npad, 2 * qkp)),                 # hoisted K|V (bf16)
        _const_spec((1, Npad)),                       # additive key-padding bias
        _const_spec((CP, CP)), _const_spec((1, CP)),  # gin w1/b1
        _const_spec((CP, CP)), _const_spec((1, CP)),  # gin w2/b2
        _const_spec((CP, qkp)), _const_spec((1, qkp)),  # Wq/bq (heads packed)
        _const_spec((qkp, CP)), _const_spec((1, CP)),   # Wo/bo
        _const_spec((CP, FP)), _const_spec((1, FP)),    # ff w1/b1
        _const_spec((FP, CP)), _const_spec((1, CP)),    # ff w2/b2
        _const_spec((8, CP)),                           # packed BN scale/shift
    ]
    return pl.pallas_call(
        kern,
        out_shape=(jax.ShapeDtypeStruct((Npad, CP), jnp.float32),
                   jax.ShapeDtypeStruct((Npad, CP), jnp.bfloat16)),
        grid=(Npad // TM,),
        in_specs=in_specs,
        out_specs=(pl.BlockSpec((TM, CP), lambda i: (i, 0)),
                   pl.BlockSpec((TM, CP), lambda i: (i, 0))),
        compiler_params=pltpu.CompilerParams(
            dimension_semantics=("parallel",),
            vmem_limit_bytes=_vmem_limit(*operands,
                                         extra_bytes=heads * TM * Npad * 4)),
    )(*operands)


def pool_readout(P, h16, rp):
    Bp = P.shape[0]
    OP = rp["w3"].shape[1]
    operands = (P, h16, rp["w1"], rp["b1"], rp["w2"], rp["b2"], rp["w3"], rp["b3"])
    return pl.pallas_call(
        _pool_readout_kernel,
        out_shape=jax.ShapeDtypeStruct((Bp, OP), jnp.float32),
        grid=(1,),
        in_specs=[_const_spec(op.shape) for op in operands],
        out_specs=pl.BlockSpec((Bp, OP), lambda i: (0, 0)),
        compiler_params=pltpu.CompilerParams(
            dimension_semantics=("arbitrary",),
            vmem_limit_bytes=_vmem_limit(*operands)),
    )(*operands)


# ----------------------------- parameters -----------------------------

def init_gps_params(key, input_dim, hidden_dim, num_layers, output_dim, heads=2):
    C = hidden_dim
    assert C % heads == 0, "hidden_dim must be divisible by heads"
    Dh = C // heads
    CP = _round_up(C, LANE)
    QKP = _round_up(C, LANE)          # heads packed into ONE lane block (no 8x padding)
    DinP = _round_up(input_dim, LANE)
    FP = _round_up(2 * C, LANE)       # GPSConv feed-forward hidden = 2*channels
    H1P = _round_up(max(C // 2, 1), LANE)
    H2P = _round_up(max(C // 4, 1), LANE)
    OP = _round_up(output_dim, LANE)
    edge_dim = 4 if output_dim == 1 else 3
    bn_eps = 1e-5

    keys = iter(jax.random.split(key, 5 + 8 * num_layers))

    def lin(k, fin, fout, fin_p, fout_p):
        k1, k2 = jax.random.split(k)
        w = jax.random.normal(k1, (fin, fout), jnp.float32) / jnp.sqrt(float(fin))
        b = jax.random.normal(k2, (fout,), jnp.float32) * 0.01
        wp = jnp.zeros((fin_p, fout_p), jnp.float32).at[:fin, :fout].set(w)
        bp = jnp.zeros((1, fout_p), jnp.float32).at[0, :fout].set(b)
        return wp.astype(jnp.bfloat16), bp

    params = {"cfg": dict(C=C, CP=CP, DinP=DinP, QKP=QKP, heads=heads, Dh=Dh,
                          output_dim=output_dim, num_layers=num_layers)}
    params["node_w"], params["node_b"] = lin(next(keys), input_dim, C, DinP, CP)
    # edge_emb / pe_lin / pe_norm exist in the PyTorch __init__ but do not affect
    # the forward output; embedding table kept only for structural parity.
    params["edge_emb"] = jax.random.normal(next(keys), (edge_dim, C), jnp.float32) * 0.1

    # BatchNorm1d (eval mode, default running stats) folded to scale/shift.
    bn_scale = float(1.0 / jnp.sqrt(1.0 + bn_eps))
    bn = jnp.zeros((8, CP), jnp.float32)
    bn = bn.at[0].set(bn_scale).at[2].set(bn_scale).at[4].set(bn_scale)

    names = ("gw1", "gb1", "gw2", "gb2", "wqkv", "bqkv", "wo", "bo",
             "fw1", "fb1", "fw2", "fb2", "bn")
    layers = {n: [] for n in names}
    for _ in range(num_layers):
        gw1, gb1 = lin(next(keys), C, C, CP, CP)          # GIN MLP
        gw2, gb2 = lin(next(keys), C, C, CP, CP)
        wq, bq = lin(next(keys), C, C, CP, QKP)           # MHA in_proj (heads contiguous)
        wk, bk = lin(next(keys), C, C, CP, QKP)
        wv, bv = lin(next(keys), C, C, CP, QKP)
        wo, bo = lin(next(keys), C, C, QKP, CP)           # MHA out_proj
        fw1, fb1 = lin(next(keys), C, 2 * C, CP, FP)      # GPSConv FF
        fw2, fb2 = lin(next(keys), 2 * C, C, FP, CP)
        vals = dict(gw1=gw1, gb1=gb1, gw2=gw2, gb2=gb2,
                    wqkv=jnp.concatenate([wq, wk, wv], axis=1),   # fused QKV weight
                    bqkv=jnp.concatenate([bq, bk, bv], axis=1),
                    wo=wo, bo=bo, fw1=fw1, fb1=fb1, fw2=fw2, fb2=fb2, bn=bn)
        for n in names:
            layers[n].append(vals[n])
    params["layers"] = {n: jnp.stack(v) for n, v in layers.items()}

    rp = {}
    rp["w1"], rp["b1"] = lin(next(keys), C, max(C // 2, 1), CP, H1P)
    rp["w2"], rp["b2"] = lin(next(keys), max(C // 2, 1), max(C // 4, 1), H1P, H2P)
    rp["w3"], rp["b3"] = lin(next(keys), max(C // 4, 1), output_dim, H2P, OP)
    params["readout"] = rp
    return params


# ----------------------------- forward pass -----------------------------

def gps_forward(params, x, edge_index, edge_attr, batch, num_graphs):
    # edge_emb(edge_attr) is computed-then-discarded in the reference forward.
    del edge_attr
    cfg = params["cfg"]
    heads, Dh, QKP = cfg["heads"], cfg["Dh"], cfg["QKP"]
    DinP = cfg["DinP"]
    N = x.shape[0]
    fused = N <= FUSE_MAX_NODES
    Npad = _round_up(N, 8) if fused else _round_up(N, TM)

    xp = jnp.zeros((Npad, DinP), jnp.float32).at[:N, :x.shape[1]].set(
        x.astype(jnp.float32))

    # dense adjacency for GIN sum aggregation: A[dst, src] += 1 (bf16 MXU operand)
    src, dst = edge_index[0], edge_index[1]
    A = jnp.zeros((Npad, Npad), jnp.float32).at[dst, src].add(1.0).astype(jnp.bfloat16)
    # TODO(synk): for large graphs replace the dense A@h / P@h matmuls with a
    # scalar-prefetch CSR gather + segment-sum kernel (O(E) instead of O(N^2)).

    # additive key-padding bias (0 for real nodes, -1e30 for padding), f32
    kbias = jnp.where(jnp.arange(Npad) < N, 0.0, NEG_INF).astype(
        jnp.float32).reshape(1, Npad)

    # global_add_pool as a pooling matmul P @ h
    Bp = _round_up(max(num_graphs, 1), 8)
    P = jnp.zeros((Bp, Npad), jnp.float32).at[batch, jnp.arange(N)].set(1.0)
    P = P.astype(jnp.bfloat16)

    if fused:
        y = fused_forward(params, xp, A, kbias, P, heads=heads, dh=Dh, qkp=QKP)
    else:
        L = params["layers"]
        h32, h16 = node_emb(xp, params["node_w"], params["node_b"])
        for l in range(cfg["num_layers"]):
            wqkv, bqkv = L["wqkv"][l], L["bqkv"][l]
            lw = dict(gw1=L["gw1"][l], gb1=L["gb1"][l],
                      gw2=L["gw2"][l], gb2=L["gb2"][l],
                      wq=wqkv[:, :QKP], bq=bqkv[:, :QKP],
                      wo=L["wo"][l], bo=L["bo"][l],
                      fw1=L["fw1"][l], fb1=L["fb1"][l],
                      fw2=L["fw2"][l], fb2=L["fb2"][l], bn=L["bn"][l])
            kv = kv_proj(h16, wqkv[:, QKP:], bqkv[:, QKP:])   # hoisted K/V (once/layer)
            h32, h16 = gps_layer(A, h16, h32, kv, kbias, lw,
                                 heads=heads, dh=Dh, qkp=QKP)
        y = pool_readout(P, h16, params["readout"])

    return y[:num_graphs, :cfg["output_dim"]]


# ----------------------------- demo -----------------------------

if __name__ == "__main__":
    key = jax.random.PRNGKey(0)
    k_x, k_e, k_p, k_x2, k_e2 = jax.random.split(key, 5)

    # args: input_dim=6, hidden_dim=32, hidden_layers=(32,), output_dim=1
    input_dim, hidden_dim, output_dim = 6, 32, 1
    num_layers = 1 + 1          # len(hidden_layers) + 1
    heads = 2
    params = init_gps_params(k_p, input_dim, hidden_dim, num_layers,
                             output_dim, heads)

    # --- case 1: tiny graph -> fully fused single-call forward ---
    N, E, num_graphs = 16, 24, 2
    x = jax.random.normal(k_x, (N, input_dim), jnp.float32)
    edge_index = jax.random.randint(k_e, (2, E), 0, N)
    edge_attr = jax.random.randint(k_e, (E,), 0, 4)     # edge_dim=4 (output_dim==1)
    batch = jnp.concatenate([jnp.zeros((N // 2,), jnp.int32),
                             jnp.ones((N - N // 2,), jnp.int32)])
    out = gps_forward(params, x, edge_index, edge_attr, batch, num_graphs)
    out = jax.block_until_ready(out)
    assert out.shape == (num_graphs, output_dim)
    assert bool(jnp.all(jnp.isfinite(out)))

    # --- case 2: multi-tile graph -> tiled path (hoisted K/V, bf16 h_full) ---
    N2, E2, G2 = 200, 600, 3
    x2 = jax.random.normal(k_x2, (N2, input_dim), jnp.float32)
    edge_index2 = jax.random.randint(k_e2, (2, E2), 0, N2)
    edge_attr2 = jnp.zeros((E2,), jnp.int32)
    batch2 = (jnp.arange(N2) * G2 // N2).astype(jnp.int32)
    out2 = gps_forward(params, x2, edge_index2, edge_attr2, batch2, G2)
    out2 = jax.block_until_ready(out2)
    assert out2.shape == (G2, output_dim)
    assert bool(jnp.all(jnp.isfinite(out2)))

    print("KERNEL_OK")
</pallas_src>

<mosaic_0001>
module attributes {stable_mosaic.version = 11 : i64} {
  func.func @_fused_forward_kernel(%arg0: i32, %arg1: memref<16x128xf32, #tpu.memory_space<vmem>>, %arg2: memref<16x16xbf16, #tpu.memory_space<vmem>>, %arg3: memref<1x16xf32, #tpu.memory_space<vmem>>, %arg4: memref<8x16xbf16, #tpu.memory_space<vmem>>, %arg5: memref<128x128xbf16, #tpu.memory_space<vmem>>, %arg6: memref<1x128xf32, #tpu.memory_space<vmem>>, %arg7: memref<2x128x128xbf16, #tpu.memory_space<vmem>>, %arg8: memref<2x1x128xf32, #tpu.memory_space<vmem>>, %arg9: memref<2x128x128xbf16, #tpu.memory_space<vmem>>, %arg10: memref<2x1x128xf32, #tpu.memory_space<vmem>>, %arg11: memref<2x128x384xbf16, #tpu.memory_space<vmem>>, %arg12: memref<2x1x384xf32, #tpu.memory_space<vmem>>, %arg13: memref<2x128x128xbf16, #tpu.memory_space<vmem>>, %arg14: memref<2x1x128xf32, #tpu.memory_space<vmem>>, %arg15: memref<2x128x128xbf16, #tpu.memory_space<vmem>>, %arg16: memref<2x1x128xf32, #tpu.memory_space<vmem>>, %arg17: memref<2x128x128xbf16, #tpu.memory_space<vmem>>, %arg18: memref<2x1x128xf32, #tpu.memory_space<vmem>>, %arg19: memref<2x8x128xf32, #tpu.memory_space<vmem>>, %arg20: memref<128x128xbf16, #tpu.memory_space<vmem>>, %arg21: memref<1x128xf32, #tpu.memory_space<vmem>>, %arg22: memref<128x128xbf16, #tpu.memory_space<vmem>>, %arg23: memref<1x128xf32, #tpu.memory_space<vmem>>, %arg24: memref<128x128xbf16, #tpu.memory_space<vmem>>, %arg25: memref<1x128xf32, #tpu.memory_space<vmem>>, %arg26: memref<8x128xf32, #tpu.memory_space<vmem>>) attributes {dimension_semantics = [#tpu.dimension_semantics<arbitrary>], iteration_bounds = array<i64: 1>, scalar_prefetch = 0 : i64, scratch_operands = 0 : i64, tpu.core_type = #tpu.core_type<tc>, window_params = [{pipeline_mode = #tpu.pipeline_mode<synchronous>, transform_indices = @transform_0, window_bounds = array<i64: 16, 128>}, {pipeline_mode = #tpu.pipeline_mode<synchronous>, transform_indices = @transform_1, window_bounds = array<i64: 16, 16>}, {pipeline_mode = #tpu.pipeline_mode<synchronous>, transform_indices = @transform_2, window_bounds = array<i64: 1, 16>}, {pipeline_mode = #tpu.pipeline_mode<synchronous>, transform_indices = @transform_3, window_bounds = array<i64: 8, 16>}, {pipeline_mode = #tpu.pipeline_mode<synchronous>, transform_indices = @transform_4, window_bounds = array<i64: 128, 128>}, {pipeline_mode = #tpu.pipeline_mode<synchronous>, transform_indices = @transform_5, window_bounds = array<i64: 1, 128>}, {pipeline_mode = #tpu.pipeline_mode<synchronous>, transform_indices = @transform_6, window_bounds = array<i64: 2, 128, 128>}, {pipeline_mode = #tpu.pipeline_mode<synchronous>, transform_indices = @transform_7, window_bounds = array<i64: 2, 1, 128>}, {pipeline_mode = #tpu.pipeline_mode<synchronous>, transform_indices = @transform_8, window_bounds = array<i64: 2, 128, 128>}, {pipeline_mode = #tpu.pipeline_mode<synchronous>, transform_indices = @transform_9, window_bounds = array<i64: 2, 1, 128>}, {pipeline_mode = #tpu.pipeline_mode<synchronous>, transform_indices = @transform_10, window_bounds = array<i64: 2, 128, 384>}, {pipeline_mode = #tpu.pipeline_mode<synchronous>, transform_indices = @transform_11, window_bounds = array<i64: 2, 1, 384>}, {pipeline_mode = #tpu.pipeline_mode<synchronous>, transform_indices = @transform_12, window_bounds = array<i64: 2, 128, 128>}, {pipeline_mode = #tpu.pipeline_mode<synchronous>, transform_indices = @transform_13, window_bounds = array<i64: 2, 1, 128>}, {pipeline_mode = #tpu.pipeline_mode<synchronous>, transform_indices = @transform_14, window_bounds = array<i64: 2, 128, 128>}, {pipeline_mode = #tpu.pipeline_mode<synchronous>, transform_indices = @transform_15, window_bounds = array<i64: 2, 1, 128>}, {pipeline_mode = #tpu.pipeline_mode<synchronous>, transform_indices = @transform_16, window_bounds = array<i64: 2, 128, 128>}, {pipeline_mode = #tpu.pipeline_mode<synchronous>, transform_indices = @transform_17, window_bounds = array<i64: 2, 1, 128>}, {pipeline_mode = #tpu.pipeline_mode<synchronous>, transform_indices = @transform_18, window_bounds = array<i64: 2, 8, 128>}, {pipeline_mode = #tpu.pipeline_mode<synchronous>, transform_indices = @transform_19, window_bounds = array<i64: 128, 128>}, {pipeline_mode = #tpu.pipeline_mode<synchronous>, transform_indices = @transform_20, window_bounds = array<i64: 1, 128>}, {pipeline_mode = #tpu.pipeline_mode<synchronous>, transform_indices = @transform_21, window_bounds = array<i64: 128, 128>}, {pipeline_mode = #tpu.pipeline_mode<synchronous>, transform_indices = @transform_22, window_bounds = array<i64: 1, 128>}, {pipeline_mode = #tpu.pipeline_mode<synchronous>, transform_indices = @transform_23, window_bounds = array<i64: 128, 128>}, {pipeline_mode = #tpu.pipeline_mode<synchronous>, transform_indices = @transform_24, window_bounds = array<i64: 1, 128>}, {pipeline_mode = #tpu.pipeline_mode<synchronous>, transform_indices = @transform_25, window_bounds = array<i64: 8, 128>}]} {
    %c0 = arith.constant 0 : index
    %c0_0 = arith.constant 0 : index
    %0 = vector.load %arg2[%c0, %c0_0] : memref<16x16xbf16, #tpu.memory_space<vmem>>, vector<16x16xbf16>
    %c0_1 = arith.constant 0 : index
    %c0_2 = arith.constant 0 : index
    %1 = vector.load %arg3[%c0_1, %c0_2] : memref<1x16xf32, #tpu.memory_space<vmem>>, vector<1x16xf32>
    %2 = tpu.iota {dimensions = array<i32: 1>} : vector<1x128xi32>
    %c0_3 = arith.constant 0 : index
    %c0_4 = arith.constant 0 : index
    %3 = vector.load %arg1[%c0_3, %c0_4] : memref<16x128xf32, #tpu.memory_space<vmem>>, vector<16x128xf32>
    %c0_5 = arith.constant 0 : index
    %c0_6 = arith.constant 0 : index
    %4 = vector.load %arg5[%c0_5, %c0_6] : memref<128x128xbf16, #tpu.memory_space<vmem>>, vector<128x128xbf16>
    %5 = arith.truncf %3 : vector<16x128xf32> to vector<16x128xbf16>
    %cst = arith.constant dense<0.000000e+00> : vector<16x128xf32>
    %6 = tpu.matmul %5, %4, %cst {dimension_numbers = #tpu.dot_dimension_numbers<[1], [0], [0], [1], [0, 0, 1, 1], [], []>} : vector<16x128xbf16>, vector<128x128xbf16>, vector<16x128xf32> -> vector<16x128xf32>
    %c0_7 = arith.constant 0 : index
    %c0_8 = arith.constant 0 : index
    %7 = vector.load %arg6[%c0_7, %c0_8] : memref<1x128xf32, #tpu.memory_space<vmem>>, vector<1x128xf32>
    %8 = vector.broadcast %7 : vector<1x128xf32> to vector<16x128xf32>
    %9 = arith.addf %6, %8 : vector<16x128xf32>
    %10 = arith.truncf %9 : vector<16x128xf32> to vector<16x128xbf16>
    %c0_9 = arith.constant 0 : index
    %c0_10 = arith.constant 0 : index
    %c0_11 = arith.constant 0 : index
    %11 = vector.load %arg11[%c0_9, %c0_10, %c0_11] : memref<2x128x384xbf16, #tpu.memory_space<vmem>>, vector<1x128x384xbf16>
    %12 = vector.shape_cast %11 : vector<1x128x384xbf16> to vector<128x384xbf16>
    %c0_12 = arith.constant 0 : index
    %c0_13 = arith.constant 0 : index
    %c0_14 = arith.constant 0 : index
    %13 = vector.load %arg7[%c0_12, %c0_13, %c0_14] : memref<2x128x128xbf16, #tpu.memory_space<vmem>>, vector<1x128x128xbf16>
    %14 = vector.shape_cast %13 : vector<1x128x128xbf16> to vector<128x128xbf16>
    %c0_15 = arith.constant 0 : index
    %c0_16 = arith.constant 0 : index
    %c0_17 = arith.constant 0 : index
    %15 = vector.load %arg8[%c0_15, %c0_16, %c0_17] : memref<2x1x128xf32, #tpu.memory_space<vmem>>, vector<1x1x128xf32>
    %16 = vector.shape_cast %15 : vector<1x1x128xf32> to vector<1x128xf32>
    %c0_18 = arith.constant 0 : index
    %c0_19 = arith.constant 0 : index
    %c0_20 = arith.constant 0 : index
    %17 = vector.load %arg9[%c0_18, %c0_19, %c0_20] : memref<2x128x128xbf16, #tpu.memory_space<vmem>>, vector<1x128x128xbf16>
    %18 = vector.shape_cast %17 : vector<1x128x128xbf16> to vector<128x128xbf16>
    %c0_21 = arith.constant 0 : index
    %c0_22 = arith.constant 0 : index
    %c0_23 = arith.constant 0 : index
    %19 = vector.load %arg10[%c0_21, %c0_22, %c0_23] : memref<2x1x128xf32, #tpu.memory_space<vmem>>, vector<1x1x128xf32>
    %20 = vector.shape_cast %19 : vector<1x1x128xf32> to vector<1x128xf32>
    %c0_24 = arith.constant 0 : index
    %c0_25 = arith.constant 0 : index
    %c0_26 = arith.constant 0 : index
    %21 = vector.load %arg12[%c0_24, %c0_25, %c0_26] : memref<2x1x384xf32, #tpu.memory_space<vmem>>, vector<1x1x384xf32>
    %22 = vector.shape_cast %21 : vector<1x1x384xf32> to vector<1x384xf32>
    %c0_27 = arith.constant 0 : index
    %c0_28 = arith.constant 0 : index
    %c0_29 = arith.constant 0 : index
    %23 = vector.load %arg13[%c0_27, %c0_28, %c0_29] : memref<2x128x128xbf16, #tpu.memory_space<vmem>>, vector<1x128x128xbf16>
    %24 = vector.shape_cast %23 : vector<1x128x128xbf16> to vector<128x128xbf16>
    %c0_30 = arith.constant 0 : index
    %c0_31 = arith.constant 0 : index
    %c0_32 = arith.constant 0 : index
    %25 = vector.load %arg14[%c0_30, %c0_31, %c0_32] : memref<2x1x128xf32, #tpu.memory_space<vmem>>, vector<1x1x128xf32>
    %26 = vector.shape_cast %25 : vector<1x1x128xf32> to vector<1x128xf32>
    %c0_33 = arith.constant 0 : index
    %c0_34 = arith.constant 0 : index
    %c0_35 = arith.constant 0 : index
    %27 = vector.load %arg15[%c0_33, %c0_34, %c0_35] : memref<2x128x128xbf16, #tpu.memory_space<vmem>>, vector<1x128x128xbf16>
    %28 = vector.shape_cast %27 : vector<1x128x128xbf16> to vector<128x128xbf16>
    %c0_36 = arith.constant 0 : index
    %c0_37 = arith.constant 0 : index
    %c0_38 = arith.constant 0 : index
    %29 = vector.load %arg16[%c0_36, %c0_37, %c0_38] : memref<2x1x128xf32, #tpu.memory_space<vmem>>, vector<1x1x128xf32>
    %30 = vector.shape_cast %29 : vector<1x1x128xf32> to vector<1x128xf32>
    %c0_39 = arith.constant 0 : index
    %c0_40 = arith.constant 0 : index
    %c0_41 = arith.constant 0 : index
    %31 = vector.load %arg17[%c0_39, %c0_40, %c0_41] : memref<2x128x128xbf16, #tpu.memory_space<vmem>>, vector<1x128x128xbf16>
    %32 = vector.shape_cast %31 : vector<1x128x128xbf16> to vector<128x128xbf16>
    %c0_42 = arith.constant 0 : index
    %c0_43 = arith.constant 0 : index
    %c0_44 = arith.constant 0 : index
    %33 = vector.load %arg18[%c0_42, %c0_43, %c0_44] : memref<2x1x128xf32, #tpu.memory_space<vmem>>, vector<1x1x128xf32>
    %34 = vector.shape_cast %33 : vector<1x1x128xf32> to vector<1x128xf32>
    %c0_45 = arith.constant 0 : index
    %c0_46 = arith.constant 0 : index
    %c0_47 = arith.constant 0 : index
    %35 = vector.load %arg19[%c0_45, %c0_46, %c0_47] : memref<2x8x128xf32, #tpu.memory_space<vmem>>, vector<1x8x128xf32>
    %36 = vector.shape_cast %35 : vector<1x8x128xf32> to vector<8x128xf32>
    %cst_48 = arith.constant dense<0.000000e+00> : vector<16x128xf32>
    %37 = tpu.matmul %0, %10, %cst_48 {dimension_numbers = #tpu.dot_dimension_numbers<[1], [0], [0], [1], [0, 0, 1, 1], [], []>} : vector<16x16xbf16>, vector<16x128xbf16>, vector<16x128xf32> -> vector<16x128xf32>
    %38 = arith.addf %37, %9 : vector<16x128xf32>
    %39 = arith.truncf %38 : vector<16x128xf32> to vector<16x128xbf16>
    %cst_49 = arith.constant dense<0.000000e+00> : vector<16x128xf32>
    %40 = tpu.matmul %39, %14, %cst_49 {dimension_numbers = #tpu.dot_dimension_numbers<[1], [0], [0], [1], [0, 0, 1, 1], [], []>} : vector<16x128xbf16>, vector<128x128xbf16>, vector<16x128xf32> -> vector<16x128xf32>
    %41 = vector.broadcast %16 : vector<1x128xf32> to vector<16x128xf32>
    %42 = arith.addf %40, %41 : vector<16x128xf32>
    %cst_50 = arith.constant 0.000000e+00 : f32
    %43 = vector.broadcast %cst_50 : f32 to vector<16x128xf32>
    %44 = arith.maximumf %42, %43 : vector<16x128xf32>
    %45 = arith.truncf %44 : vector<16x128xf32> to vector<16x128xbf16>
    %cst_51 = arith.constant dense<0.000000e+00> : vector<16x128xf32>
    %46 = tpu.matmul %45, %18, %cst_51 {dimension_numbers = #tpu.dot_dimension_numbers<[1], [0], [0], [1], [0, 0, 1, 1], [], []>} : vector<16x128xbf16>, vector<128x128xbf16>, vector<16x128xf32> -> vector<16x128xf32>
    %47 = vector.broadcast %20 : vector<1x128xf32> to vector<16x128xf32>
    %48 = arith.addf %46, %47 : vector<16x128xf32>
    %49 = arith.addf %48, %9 : vector<16x128xf32>
    %50 = vector.extract_strided_slice %36 {offsets = [0, 0], sizes = [1, 128], strides = [1, 1]} : vector<8x128xf32> to vector<1x128xf32>
    %51 = vector.broadcast %50 : vector<1x128xf32> to vector<16x128xf32>
    %52 = arith.mulf %49, %51 : vector<16x128xf32>
    %53 = vector.extract_strided_slice %36 {offsets = [1, 0], sizes = [1, 128], strides = [1, 1]} : vector<8x128xf32> to vector<1x128xf32>
    %54 = vector.broadcast %53 : vector<1x128xf32> to vector<16x128xf32>
    %55 = arith.addf %52, %54 : vector<16x128xf32>
    %cst_52 = arith.constant dense<0.000000e+00> : vector<16x384xf32>
    %56 = tpu.matmul %10, %12, %cst_52 {dimension_numbers = #tpu.dot_dimension_numbers<[1], [0], [0], [1], [0, 0, 1, 1], [], []>} : vector<16x128xbf16>, vector<128x384xbf16>, vector<16x384xf32> -> vector<16x384xf32>
    %57 = vector.broadcast %22 : vector<1x384xf32> to vector<16x384xf32>
    %58 = arith.addf %56, %57 : vector<16x384xf32>
    %59 = vector.extract_strided_slice %58 {offsets = [0, 0], sizes = [16, 128], strides = [1, 1]} : vector<16x384xf32> to vector<16x128xf32>
    %60 = vector.extract_strided_slice %58 {offsets = [0, 128], sizes = [16, 128], strides = [1, 1]} : vector<16x384xf32> to vector<16x128xf32>
    %61 = arith.truncf %60 : vector<16x128xf32> to vector<16x128xbf16>
    %62 = vector.extract_strided_slice %58 {offsets = [0, 256], sizes = [16, 128], strides = [1, 1]} : vector<16x384xf32> to vector<16x128xf32>
    %63 = arith.truncf %62 : vector<16x128xf32> to vector<16x128xbf16>
    %cst_53 = arith.constant 0.000000e+00 : f32
    %64 = vector.broadcast %cst_53 : f32 to vector<16x128xf32>
    %c0_i32 = arith.constant 0 : i32
    %65 = vector.broadcast %c0_i32 : i32 to vector<1x128xi32>
    %66 = arith.cmpi sge, %2, %65 : vector<1x128xi32>
    %c16_i32 = arith.constant 16 : i32
    %67 = vector.broadcast %c16_i32 : i32 to vector<1x128xi32>
    %68 = arith.cmpi slt, %2, %67 : vector<1x128xi32>
    %69 = arith.andi %66, %68 : vector<1x128xi1>
    %70 = arith.extui %69 : vector<1x128xi1> to vector<1x128xi32>
    %71 = arith.sitofp %70 : vector<1x128xi32> to vector<1x128xf32>
    %72 = vector.broadcast %71 : vector<1x128xf32> to vector<16x128xf32>
    %73 = arith.mulf %59, %72 : vector<16x128xf32>
    %74 = arith.truncf %73 : vector<16x128xf32> to vector<16x128xbf16>
    %cst_54 = arith.constant dense<0.000000e+00> : vector<16x16xf32>
    %75 = tpu.matmul %74, %61, %cst_54 {dimension_numbers = #tpu.dot_dimension_numbers<[1], [1], [0], [0], [0, 0, 1, 0], [], []>} : vector<16x128xbf16>, vector<16x128xbf16>, vector<16x16xf32> -> vector<16x16xf32>
    %cst_55 = arith.constant 2.500000e-01 : f32
    %76 = vector.broadcast %cst_55 : f32 to vector<16x16xf32>
    %77 = arith.mulf %75, %76 : vector<16x16xf32>
    %78 = vector.broadcast %1 : vector<1x16xf32> to vector<16x16xf32>
    %79 = arith.addf %77, %78 : vector<16x16xf32>
    %cst_56 = arith.constant dense<0xFF800000> : vector<16xf32>
    %80 = vector.multi_reduction <maximumf>, %79, %cst_56 [1] : vector<16x16xf32> to vector<16xf32>
    %81 = vector.shape_cast %80 : vector<16xf32> to vector<16x1xf32>
    %82 = vector.broadcast %81 : vector<16x1xf32> to vector<16x16xf32>
    %83 = arith.subf %79, %82 : vector<16x16xf32>
    %84 = math.exp %83 : vector<16x16xf32>
    %cst_57 = arith.constant dense<0.000000e+00> : vector<16xf32>
    %85 = vector.multi_reduction <add>, %84, %cst_57 [1] : vector<16x16xf32> to vector<16xf32>
    %86 = vector.shape_cast %85 : vector<16xf32> to vector<16x1xf32>
    %87 = tpu.reciprocal %86 {approx = true} : vector<16x1xf32> -> vector<16x1xf32>
    %88 = vector.broadcast %87 : vector<16x1xf32> to vector<16x16xf32>
    %89 = arith.mulf %84, %88 : vector<16x16xf32>
    %90 = arith.truncf %89 : vector<16x16xf32> to vector<16x16xbf16>
    %cst_58 = arith.constant dense<0.000000e+00> : vector<16x128xf32>
    %91 = tpu.matmul %90, %63, %cst_58 {dimension_numbers = #tpu.dot_dimension_numbers<[1], [0], [0], [1], [0, 0, 1, 1], [], []>} : vector<16x16xbf16>, vector<16x128xbf16>, vector<16x128xf32> -> vector<16x128xf32>
    %92 = vector.broadcast %71 : vector<1x128xf32> to vector<16x128xf32>
    %93 = arith.mulf %92, %91 : vector<16x128xf32>
    %94 = arith.addf %64, %93 : vector<16x128xf32>
    %c16_i32_59 = arith.constant 16 : i32
    %95 = vector.broadcast %c16_i32_59 : i32 to vector<1x128xi32>
    %96 = arith.cmpi sge, %2, %95 : vector<1x128xi32>
    %c32_i32 = arith.constant 32 : i32
    %97 = vector.broadcast %c32_i32 : i32 to vector<1x128xi32>
    %98 = arith.cmpi slt, %2, %97 : vector<1x128xi32>
    %99 = arith.andi %96, %98 : vector<1x128xi1>
    %100 = arith.extui %99 : vector<1x128xi1> to vector<1x128xi32>
    %101 = arith.sitofp %100 : vector<1x128xi32> to vector<1x128xf32>
    %102 = vector.broadcast %101 : vector<1x128xf32> to vector<16x128xf32>
    %103 = arith.mulf %59, %102 : vector<16x128xf32>
    %104 = arith.truncf %103 : vector<16x128xf32> to vector<16x128xbf16>
    %cst_60 = arith.constant dense<0.000000e+00> : vector<16x16xf32>
    %105 = tpu.matmul %104, %61, %cst_60 {dimension_numbers = #tpu.dot_dimension_numbers<[1], [1], [0], [0], [0, 0, 1, 0], [], []>} : vector<16x128xbf16>, vector<16x128xbf16>, vector<16x16xf32> -> vector<16x16xf32>
    %cst_61 = arith.constant 2.500000e-01 : f32
    %106 = vector.broadcast %cst_61 : f32 to vector<16x16xf32>
    %107 = arith.mulf %105, %106 : vector<16x16xf32>
    %108 = vector.broadcast %1 : vector<1x16xf32> to vector<16x16xf32>
    %109 = arith.addf %107, %108 : vector<16x16xf32>
    %cst_62 = arith.constant dense<0xFF800000> : vector<16xf32>
    %110 = vector.multi_reduction <maximumf>, %109, %cst_62 [1] : vector<16x16xf32> to vector<16xf32>
    %111 = vector.shape_cast %110 : vector<16xf32> to vector<16x1xf32>
    %112 = vector.broadcast %111 : vector<16x1xf32> to vector<16x16xf32>
    %113 = arith.subf %109, %112 : vector<16x16xf32>
    %114 = math.exp %113 : vector<16x16xf32>
    %cst_63 = arith.constant dense<0.000000e+00> : vector<16xf32>
    %115 = vector.multi_reduction <add>, %114, %cst_63 [1] : vector<16x16xf32> to vector<16xf32>
    %116 = vector.shape_cast %115 : vector<16xf32> to vector<16x1xf32>
    %117 = tpu.reciprocal %116 {approx = true} : vector<16x1xf32> -> vector<16x1xf32>
    %118 = vector.broadcast %117 : vector<16x1xf32> to vector<16x16xf32>
    %119 = arith.mulf %114, %118 : vector<16x16xf32>
    %120 = arith.truncf %119 : vector<16x16xf32> to vector<16x16xbf16>
    %cst_64 = arith.constant dense<0.000000e+00> : vector<16x128xf32>
    %121 = tpu.matmul %120, %63, %cst_64 {dimension_numbers = #tpu.dot_dimension_numbers<[1], [0], [0], [1], [0, 0, 1, 1], [], []>} : vector<16x16xbf16>, vector<16x128xbf16>, vector<16x128xf32> -> vector<16x128xf32>
    %122 = vector.broadcast %101 : vector<1x128xf32> to vector<16x128xf32>
    %123 = arith.mulf %122, %121 : vector<16x128xf32>
    %124 = arith.addf %94, %123 : vector<16x128xf32>
    %125 = arith.truncf %124 : vector<16x128xf32> to vector<16x128xbf16>
    %cst_65 = arith.constant dense<0.000000e+00> : vector<16x128xf32>
    %126 = tpu.matmul %125, %24, %cst_65 {dimension_numbers = #tpu.dot_dimension_numbers<[1], [0], [0], [1], [0, 0, 1, 1], [], []>} : vector<16x128xbf16>, vector<128x128xbf16>, vector<16x128xf32> -> vector<16x128xf32>
    %127 = vector.broadcast %26 : vector<1x128xf32> to vector<16x128xf32>
    %128 = arith.addf %126, %127 : vector<16x128xf32>
    %129 = arith.addf %128, %9 : vector<16x128xf32>
    %130 = vector.extract_strided_slice %36 {offsets = [2, 0], sizes = [1, 128], strides = [1, 1]} : vector<8x128xf32> to vector<1x128xf32>
    %131 = vector.broadcast %130 : vector<1x128xf32> to vector<16x128xf32>
    %132 = arith.mulf %129, %131 : vector<16x128xf32>
    %133 = vector.extract_strided_slice %36 {offsets = [3, 0], sizes = [1, 128], strides = [1, 1]} : vector<8x128xf32> to vector<1x128xf32>
    %134 = vector.broadcast %133 : vector<1x128xf32> to vector<16x128xf32>
    %135 = arith.addf %132, %134 : vector<16x128xf32>
    %136 = arith.addf %55, %135 : vector<16x128xf32>
    %137 = arith.truncf %136 : vector<16x128xf32> to vector<16x128xbf16>
    %cst_66 = arith.constant dense<0.000000e+00> : vector<16x128xf32>
    %138 = tpu.matmul %137, %28, %cst_66 {dimension_numbers = #tpu.dot_dimension_numbers<[1], [0], [0], [1], [0, 0, 1, 1], [], []>} : vector<16x128xbf16>, vector<128x128xbf16>, vector<16x128xf32> -> vector<16x128xf32>
    %139 = vector.broadcast %30 : vector<1x128xf32> to vector<16x128xf32>
    %140 = arith.addf %138, %139 : vector<16x128xf32>
    %cst_67 = arith.constant 0.000000e+00 : f32
    %141 = vector.broadcast %cst_67 : f32 to vector<16x128xf32>
    %142 = arith.maximumf %140, %141 : vector<16x128xf32>
    %143 = arith.truncf %142 : vector<16x128xf32> to vector<16x128xbf16>
    %cst_68 = arith.constant dense<0.000000e+00> : vector<16x128xf32>
    %144 = tpu.matmul %143, %32, %cst_68 {dimension_numbers = #tpu.dot_dimension_numbers<[1], [0], [0], [1], [0, 0, 1, 1], [], []>} : vector<16x128xbf16>, vector<128x128xbf16>, vector<16x128xf32> -> vector<16x128xf32>
    %145 = vector.broadcast %34 : vector<1x128xf32> to vector<16x128xf32>
    %146 = arith.addf %144, %145 : vector<16x128xf32>
    %147 = arith.addf %136, %146 : vector<16x128xf32>
    %148 = vector.extract_strided_slice %36 {offsets = [4, 0], sizes = [1, 128], strides = [1, 1]} : vector<8x128xf32> to vector<1x128xf32>
    %149 = vector.broadcast %148 : vector<1x128xf32> to vector<16x128xf32>
    %150 = arith.mulf %147, %149 : vector<16x128xf32>
    %151 = vector.extract_strided_slice %36 {offsets = [5, 0], sizes = [1, 128], strides = [1, 1]} : vector<8x128xf32> to vector<1x128xf32>
    %152 = vector.broadcast %151 : vector<1x128xf32> to vector<16x128xf32>
    %153 = arith.addf %150, %152 : vector<16x128xf32>
    %154 = arith.truncf %153 : vector<16x128xf32> to vector<16x128xbf16>
    %c1 = arith.constant 1 : index
    %c0_69 = arith.constant 0 : index
    %c0_70 = arith.constant 0 : index
    %155 = vector.load %arg11[%c1, %c0_69, %c0_70] : memref<2x128x384xbf16, #tpu.memory_space<vmem>>, vector<1x128x384xbf16>
    %156 = vector.shape_cast %155 : vector<1x128x384xbf16> to vector<128x384xbf16>
    %c1_71 = arith.constant 1 : index
    %c0_72 = arith.constant 0 : index
    %c0_73 = arith.constant 0 : index
    %157 = vector.load %arg7[%c1_71, %c0_72, %c0_73] : memref<2x128x128xbf16, #tpu.memory_space<vmem>>, vector<1x128x128xbf16>
    %158 = vector.shape_cast %157 : vector<1x128x128xbf16> to vector<128x128xbf16>
    %c1_74 = arith.constant 1 : index
    %c0_75 = arith.constant 0 : index
    %c0_76 = arith.constant 0 : index
    %159 = vector.load %arg8[%c1_74, %c0_75, %c0_76] : memref<2x1x128xf32, #tpu.memory_space<vmem>>, vector<1x1x128xf32>
    %160 = vector.shape_cast %159 : vector<1x1x128xf32> to vector<1x128xf32>
    %c1_77 = arith.constant 1 : index
    %c0_78 = arith.constant 0 : index
    %c0_79 = arith.constant 0 : index
    %161 = vector.load %arg9[%c1_77, %c0_78, %c0_79] : memref<2x128x128xbf16, #tpu.memory_space<vmem>>, vector<1x128x128xbf16>
    %162 = vector.shape_cast %161 : vector<1x128x128xbf16> to vector<128x128xbf16>
    %c1_80 = arith.constant 1 : index
    %c0_81 = arith.constant 0 : index
    %c0_82 = arith.constant 0 : index
    %163 = vector.load %arg10[%c1_80, %c0_81, %c0_82] : memref<2x1x128xf32, #tpu.memory_space<vmem>>, vector<1x1x128xf32>
    %164 = vector.shape_cast %163 : vector<1x1x128xf32> to vector<1x128xf32>
    %c1_83 = arith.constant 1 : index
    %c0_84 = arith.constant 0 : index
    %c0_85 = arith.constant 0 : index
    %165 = vector.load %arg12[%c1_83, %c0_84, %c0_85] : memref<2x1x384xf32, #tpu.memory_space<vmem>>, vector<1x1x384xf32>
    %166 = vector.shape_cast %165 : vector<1x1x384xf32> to vector<1x384xf32>
    %c1_86 = arith.constant 1 : index
    %c0_87 = arith.constant 0 : index
    %c0_88 = arith.constant 0 : index
    %167 = vector.load %arg13[%c1_86, %c0_87, %c0_88] : memref<2x128x128xbf16, #tpu.memory_space<vmem>>, vector<1x128x128xbf16>
    %168 = vector.shape_cast %167 : vector<1x128x128xbf16> to vector<128x128xbf16>
    %c1_89 = arith.constant 1 : index
    %c0_90 = arith.constant 0 : index
    %c0_91 = arith.constant 0 : index
    %169 = vector.load %arg14[%c1_89, %c0_90, %c0_91] : memref<2x1x128xf32, #tpu.memory_space<vmem>>, vector<1x1x128xf32>
    %170 = vector.shape_cast %169 : vector<1x1x128xf32> to vector<1x128xf32>
    %c1_92 = arith.constant 1 : index
    %c0_93 = arith.constant 0 : index
    %c0_94 = arith.constant 0 : index
    %171 = vector.load %arg15[%c1_92, %c0_93, %c0_94] : memref<2x128x128xbf16, #tpu.memory_space<vmem>>, vector<1x128x128xbf16>
    %172 = vector.shape_cast %171 : vector<1x128x128xbf16> to vector<128x128xbf16>
    %c1_95 = arith.constant 1 : index
    %c0_96 = arith.constant 0 : index
    %c0_97 = arith.constant 0 : index
    %173 = vector.load %arg16[%c1_95, %c0_96, %c0_97] : memref<2x1x128xf32, #tpu.memory_space<vmem>>, vector<1x1x128xf32>
    %174 = vector.shape_cast %173 : vector<1x1x128xf32> to vector<1x128xf32>
    %c1_98 = arith.constant 1 : index
    %c0_99 = arith.constant 0 : index
    %c0_100 = arith.constant 0 : index
    %175 = vector.load %arg17[%c1_98, %c0_99, %c0_100] : memref<2x128x128xbf16, #tpu.memory_space<vmem>>, vector<1x128x128xbf16>
    %176 = vector.shape_cast %175 : vector<1x128x128xbf16> to vector<128x128xbf16>
    %c1_101 = arith.constant 1 : index
    %c0_102 = arith.constant 0 : index
    %c0_103 = arith.constant 0 : index
    %177 = vector.load %arg18[%c1_101, %c0_102, %c0_103] : memref<2x1x128xf32, #tpu.memory_space<vmem>>, vector<1x1x128xf32>
    %178 = vector.shape_cast %177 : vector<1x1x128xf32> to vector<1x128xf32>
    %c1_104 = arith.constant 1 : index
    %c0_105 = arith.constant 0 : index
    %c0_106 = arith.constant 0 : index
    %179 = vector.load %arg19[%c1_104, %c0_105, %c0_106] : memref<2x8x128xf32, #tpu.memory_space<vmem>>, vector<1x8x128xf32>
    %180 = vector.shape_cast %179 : vector<1x8x128xf32> to vector<8x128xf32>
    %cst_107 = arith.constant dense<0.000000e+00> : vector<16x128xf32>
    %181 = tpu.matmul %0, %154, %cst_107 {dimension_numbers = #tpu.dot_dimension_numbers<[1], [0], [0], [1], [0, 0, 1, 1], [], []>} : vector<16x16xbf16>, vector<16x128xbf16>, vector<16x128xf32> -> vector<16x128xf32>
    %182 = arith.addf %181, %153 : vector<16x128xf32>
    %183 = arith.truncf %182 : vector<16x128xf32> to vector<16x128xbf16>
    %cst_108 = arith.constant dense<0.000000e+00> : vector<16x128xf32>
    %184 = tpu.matmul %183, %158, %cst_108 {dimension_numbers = #tpu.dot_dimension_numbers<[1], [0], [0], [1], [0, 0, 1, 1], [], []>} : vector<16x128xbf16>, vector<128x128xbf16>, vector<16x128xf32> -> vector<16x128xf32>
    %185 = vector.broadcast %160 : vector<1x128xf32> to vector<16x128xf32>
    %186 = arith.addf %184, %185 : vector<16x128xf32>
    %cst_109 = arith.constant 0.000000e+00 : f32
    %187 = vector.broadcast %cst_109 : f32 to vector<16x128xf32>
    %188 = arith.maximumf %186, %187 : vector<16x128xf32>
    %189 = arith.truncf %188 : vector<16x128xf32> to vector<16x128xbf16>
    %cst_110 = arith.constant dense<0.000000e+00> : vector<16x128xf32>
    %190 = tpu.matmul %189, %162, %cst_110 {dimension_numbers = #tpu.dot_dimension_numbers<[1], [0], [0], [1], [0, 0, 1, 1], [], []>} : vector<16x128xbf16>, vector<128x128xbf16>, vector<16x128xf32> -> vector<16x128xf32>
    %191 = vector.broadcast %164 : vector<1x128xf32> to vector<16x128xf32>
    %192 = arith.addf %190, %191 : vector<16x128xf32>
    %193 = arith.addf %192, %153 : vector<16x128xf32>
    %194 = vector.extract_strided_slice %180 {offsets = [0, 0], sizes = [1, 128], strides = [1, 1]} : vector<8x128xf32> to vector<1x128xf32>
    %195 = vector.broadcast %194 : vector<1x128xf32> to vector<16x128xf32>
    %196 = arith.mulf %193, %195 : vector<16x128xf32>
    %197 = vector.extract_strided_slice %180 {offsets = [1, 0], sizes = [1, 128], strides = [1, 1]} : vector<8x128xf32> to vector<1x128xf32>
    %198 = vector.broadcast %197 : vector<1x128xf32> to vector<16x128xf32>
    %199 = arith.addf %196, %198 : vector<16x128xf32>
    %cst_111 = arith.constant dense<0.000000e+00> : vector<16x384xf32>
    %200 = tpu.matmul %154, %156, %cst_111 {dimension_numbers = #tpu.dot_dimension_numbers<[1], [0], [0], [1], [0, 0, 1, 1], [], []>} : vector<16x128xbf16>, vector<128x384xbf16>, vector<16x384xf32> -> vector<16x384xf32>
    %201 = vector.broadcast %166 : vector<1x384xf32> to vector<16x384xf32>
    %202 = arith.addf %200, %201 : vector<16x384xf32>
    %203 = vector.extract_strided_slice %202 {offsets = [0, 0], sizes = [16, 128], strides = [1, 1]} : vector<16x384xf32> to vector<16x128xf32>
    %204 = vector.extract_strided_slice %202 {offsets = [0, 128], sizes = [16, 128], strides = [1, 1]} : vector<16x384xf32> to vector<16x128xf32>
    %205 = arith.truncf %204 : vector<16x128xf32> to vector<16x128xbf16>
    %206 = vector.extract_strided_slice %202 {offsets = [0, 256], sizes = [16, 128], strides = [1, 1]} : vector<16x384xf32> to vector<16x128xf32>
    %207 = arith.truncf %206 : vector<16x128xf32> to vector<16x128xbf16>
    %cst_112 = arith.constant 0.000000e+00 : f32
    %208 = vector.broadcast %cst_112 : f32 to vector<16x128xf32>
    %c0_i32_113 = arith.constant 0 : i32
    %209 = vector.broadcast %c0_i32_113 : i32 to vector<1x128xi32>
    %210 = arith.cmpi sge, %2, %209 : vector<1x128xi32>
    %c16_i32_114 = arith.constant 16 : i32
    %211 = vector.broadcast %c16_i32_114 : i32 to vector<1x128xi32>
    %212 = arith.cmpi slt, %2, %211 : vector<1x128xi32>
    %213 = arith.andi %210, %212 : vector<1x128xi1>
    %214 = arith.extui %213 : vector<1x128xi1> to vector<1x128xi32>
    %215 = arith.sitofp %214 : vector<1x128xi32> to vector<1x128xf32>
    %216 = vector.broadcast %215 : vector<1x128xf32> to vector<16x128xf32>
    %217 = arith.mulf %203, %216 : vector<16x128xf32>
    %218 = arith.truncf %217 : vector<16x128xf32> to vector<16x128xbf16>
    %cst_115 = arith.constant dense<0.000000e+00> : vector<16x16xf32>
    %219 = tpu.matmul %218, %205, %cst_115 {dimension_numbers = #tpu.dot_dimension_numbers<[1], [1], [0], [0], [0, 0, 1, 0], [], []>} : vector<16x128xbf16>, vector<16x128xbf16>, vector<16x16xf32> -> vector<16x16xf32>
    %cst_116 = arith.constant 2.500000e-01 : f32
    %220 = vector.broadcast %cst_116 : f32 to vector<16x16xf32>
    %221 = arith.mulf %219, %220 : vector<16x16xf32>
    %222 = vector.broadcast %1 : vector<1x16xf32> to vector<16x16xf32>
    %223 = arith.addf %221, %222 : vector<16x16xf32>
    %cst_117 = arith.constant dense<0xFF800000> : vector<16xf32>
    %224 = vector.multi_reduction <maximumf>, %223, %cst_117 [1] : vector<16x16xf32> to vector<16xf32>
    %225 = vector.shape_cast %224 : vector<16xf32> to vector<16x1xf32>
    %226 = vector.broadcast %225 : vector<16x1xf32> to vector<16x16xf32>
    %227 = arith.subf %223, %226 : vector<16x16xf32>
    %228 = math.exp %227 : vector<16x16xf32>
    %cst_118 = arith.constant dense<0.000000e+00> : vector<16xf32>
    %229 = vector.multi_reduction <add>, %228, %cst_118 [1] : vector<16x16xf32> to vector<16xf32>
    %230 = vector.shape_cast %229 : vector<16xf32> to vector<16x1xf32>
    %231 = tpu.reciprocal %230 {approx = true} : vector<16x1xf32> -> vector<16x1xf32>
    %232 = vector.broadcast %231 : vector<16x1xf32> to vector<16x16xf32>
    %233 = arith.mulf %228, %232 : vector<16x16xf32>
    %234 = arith.truncf %233 : vector<16x16xf32> to vector<16x16xbf16>
    %cst_119 = arith.constant dense<0.000000e+00> : vector<16x128xf32>
    %235 = tpu.matmul %234, %207, %cst_119 {dimension_numbers = #tpu.dot_dimension_numbers<[1], [0], [0], [1], [0, 0, 1, 1], [], []>} : vector<16x16xbf16>, vector<16x128xbf16>, vector<16x128xf32> -> vector<16x128xf32>
    %236 = vector.broadcast %215 : vector<1x128xf32> to vector<16x128xf32>
    %237 = arith.mulf %236, %235 : vector<16x128xf32>
    %238 = arith.addf %208, %237 : vector<16x128xf32>
    %c16_i32_120 = arith.constant 16 : i32
    %239 = vector.broadcast %c16_i32_120 : i32 to vector<1x128xi32>
    %240 = arith.cmpi sge, %2, %239 : vector<1x128xi32>
    %c32_i32_121 = arith.constant 32 : i32
    %241 = vector.broadcast %c32_i32_121 : i32 to vector<1x128xi32>
    %242 = arith.cmpi slt, %2, %241 : vector<1x128xi32>
    %243 = arith.andi %240, %242 : vector<1x128xi1>
    %244 = arith.extui %243 : vector<1x128xi1> to vector<1x128xi32>
    %245 = arith.sitofp %244 : vector<1x128xi32> to vector<1x128xf32>
    %246 = vector.broadcast %245 : vector<1x128xf32> to vector<16x128xf32>
    %247 = arith.mulf %203, %246 : vector<16x128xf32>
    %248 = arith.truncf %247 : vector<16x128xf32> to vector<16x128xbf16>
    %cst_122 = arith.constant dense<0.000000e+00> : vector<16x16xf32>
    %249 = tpu.matmul %248, %205, %cst_122 {dimension_numbers = #tpu.dot_dimension_numbers<[1], [1], [0], [0], [0, 0, 1, 0], [], []>} : vector<16x128xbf16>, vector<16x128xbf16>, vector<16x16xf32> -> vector<16x16xf32>
    %cst_123 = arith.constant 2.500000e-01 : f32
    %250 = vector.broadcast %cst_123 : f32 to vector<16x16xf32>
    %251 = arith.mulf %249, %250 : vector<16x16xf32>
    %252 = vector.broadcast %1 : vector<1x16xf32> to vector<16x16xf32>
    %253 = arith.addf %251, %252 : vector<16x16xf32>
    %cst_124 = arith.constant dense<0xFF800000> : vector<16xf32>
    %254 = vector.multi_reduction <maximumf>, %253, %cst_124 [1] : vector<16x16xf32> to vector<16xf32>
    %255 = vector.shape_cast %254 : vector<16xf32> to vector<16x1xf32>
    %256 = vector.broadcast %255 : vector<16x1xf32> to vector<16x16xf32>
    %257 = arith.subf %253, %256 : vector<16x16xf32>
    %258 = math.exp %257 : vector<16x16xf32>
    %cst_125 = arith.constant dense<0.000000e+00> : vector<16xf32>
    %259 = vector.multi_reduction <add>, %258, %cst_125 [1] : vector<16x16xf32> to vector<16xf32>
    %260 = vector.shape_cast %259 : vector<16xf32> to vector<16x1xf32>
    %261 = tpu.reciprocal %260 {approx = true} : vector<16x1xf32> -> vector<16x1xf32>
    %262 = vector.broadcast %261 : vector<16x1xf32> to vector<16x16xf32>
    %263 = arith.mulf %258, %262 : vector<16x16xf32>
    %264 = arith.truncf %263 : vector<16x16xf32> to vector<16x16xbf16>
    %cst_126 = arith.constant dense<0.000000e+00> : vector<16x128xf32>
    %265 = tpu.matmul %264, %207, %cst_126 {dimension_numbers = #tpu.dot_dimension_numbers<[1], [0], [0], [1], [0, 0, 1, 1], [], []>} : vector<16x16xbf16>, vector<16x128xbf16>, vector<16x128xf32> -> vector<16x128xf32>
    %266 = vector.broadcast %245 : vector<1x128xf32> to vector<16x128xf32>
    %267 = arith.mulf %266, %265 : vector<16x128xf32>
    %268 = arith.addf %238, %267 : vector<16x128xf32>
    %269 = arith.truncf %268 : vector<16x128xf32> to vector<16x128xbf16>
    %cst_127 = arith.constant dense<0.000000e+00> : vector<16x128xf32>
    %270 = tpu.matmul %269, %168, %cst_127 {dimension_numbers = #tpu.dot_dimension_numbers<[1], [0], [0], [1], [0, 0, 1, 1], [], []>} : vector<16x128xbf16>, vector<128x128xbf16>, vector<16x128xf32> -> vector<16x128xf32>
    %271 = vector.broadcast %170 : vector<1x128xf32> to vector<16x128xf32>
    %272 = arith.addf %270, %271 : vector<16x128xf32>
    %273 = arith.addf %272, %153 : vector<16x128xf32>
    %274 = vector.extract_strided_slice %180 {offsets = [2, 0], sizes = [1, 128], strides = [1, 1]} : vector<8x128xf32> to vector<1x128xf32>
    %275 = vector.broadcast %274 : vector<1x128xf32> to vector<16x128xf32>
    %276 = arith.mulf %273, %275 : vector<16x128xf32>
    %277 = vector.extract_strided_slice %180 {offsets = [3, 0], sizes = [1, 128], strides = [1, 1]} : vector<8x128xf32> to vector<1x128xf32>
    %278 = vector.broadcast %277 : vector<1x128xf32> to vector<16x128xf32>
    %279 = arith.addf %276, %278 : vector<16x128xf32>
    %280 = arith.addf %199, %279 : vector<16x128xf32>
    %281 = arith.truncf %280 : vector<16x128xf32> to vector<16x128xbf16>
    %cst_128 = arith.constant dense<0.000000e+00> : vector<16x128xf32>
    %282 = tpu.matmul %281, %172, %cst_128 {dimension_numbers = #tpu.dot_dimension_numbers<[1], [0], [0], [1], [0, 0, 1, 1], [], []>} : vector<16x128xbf16>, vector<128x128xbf16>, vector<16x128xf32> -> vector<16x128xf32>
    %283 = vector.broadcast %174 : vector<1x128xf32> to vector<16x128xf32>
    %284 = arith.addf %282, %283 : vector<16x128xf32>
    %cst_129 = arith.constant 0.000000e+00 : f32
    %285 = vector.broadcast %cst_129 : f32 to vector<16x128xf32>
    %286 = arith.maximumf %284, %285 : vector<16x128xf32>
    %287 = arith.truncf %286 : vector<16x128xf32> to vector<16x128xbf16>
    %cst_130 = arith.constant dense<0.000000e+00> : vector<16x128xf32>
    %288 = tpu.matmul %287, %176, %cst_130 {dimension_numbers = #tpu.dot_dimension_numbers<[1], [0], [0], [1], [0, 0, 1, 1], [], []>} : vector<16x128xbf16>, vector<128x128xbf16>, vector<16x128xf32> -> vector<16x128xf32>
    %289 = vector.broadcast %178 : vector<1x128xf32> to vector<16x128xf32>
    %290 = arith.addf %288, %289 : vector<16x128xf32>
    %291 = arith.addf %280, %290 : vector<16x128xf32>
    %292 = vector.extract_strided_slice %180 {offsets = [4, 0], sizes = [1, 128], strides = [1, 1]} : vector<8x128xf32> to vector<1x128xf32>
    %293 = vector.broadcast %292 : vector<1x128xf32> to vector<16x128xf32>
    %294 = arith.mulf %291, %293 : vector<16x128xf32>
    %295 = vector.extract_strided_slice %180 {offsets = [5, 0], sizes = [1, 128], strides = [1, 1]} : vector<8x128xf32> to vector<1x128xf32>
    %296 = vector.broadcast %295 : vector<1x128xf32> to vector<16x128xf32>
    %297 = arith.addf %294, %296 : vector<16x128xf32>
    %c0_131 = arith.constant 0 : index
    %c0_132 = arith.constant 0 : index
    %298 = vector.load %arg4[%c0_131, %c0_132] : memref<8x16xbf16, #tpu.memory_space<vmem>>, vector<8x16xbf16>
    %299 = arith.truncf %297 : vector<16x128xf32> to vector<16x128xbf16>
    %cst_133 = arith.constant dense<0.000000e+00> : vector<8x128xf32>
    %300 = tpu.matmul %298, %299, %cst_133 {dimension_numbers = #tpu.dot_dimension_numbers<[1], [0], [0], [1], [0, 0, 1, 1], [], []>} : vector<8x16xbf16>, vector<16x128xbf16>, vector<8x128xf32> -> vector<8x128xf32>
    %c0_134 = arith.constant 0 : index
    %c0_135 = arith.constant 0 : index
    %301 = vector.load %arg20[%c0_134, %c0_135] : memref<128x128xbf16, #tpu.memory_space<vmem>>, vector<128x128xbf16>
    %302 = arith.truncf %300 : vector<8x128xf32> to vector<8x128xbf16>
    %cst_136 = arith.constant dense<0.000000e+00> : vector<8x128xf32>
    %303 = tpu.matmul %302, %301, %cst_136 {dimension_numbers = #tpu.dot_dimension_numbers<[1], [0], [0], [1], [0, 0, 1, 1], [], []>} : vector<8x128xbf16>, vector<128x128xbf16>, vector<8x128xf32> -> vector<8x128xf32>
    %c0_137 = arith.constant 0 : index
    %c0_138 = arith.constant 0 : index
    %304 = vector.load %arg21[%c0_137, %c0_138] : memref<1x128xf32, #tpu.memory_space<vmem>>, vector<1x128xf32>
    %305 = vector.broadcast %304 : vector<1x128xf32> to vector<8x128xf32>
    %306 = arith.addf %303, %305 : vector<8x128xf32>
    %cst_139 = arith.constant 0.000000e+00 : f32
    %307 = vector.broadcast %cst_139 : f32 to vector<8x128xf32>
    %308 = arith.maximumf %306, %307 : vector<8x128xf32>
    %c0_140 = arith.constant 0 : index
    %c0_141 = arith.constant 0 : index
    %309 = vector.load %arg22[%c0_140, %c0_141] : memref<128x128xbf16, #tpu.memory_space<vmem>>, vector<128x128xbf16>
    %310 = arith.truncf %308 : vector<8x128xf32> to vector<8x128xbf16>
    %cst_142 = arith.constant dense<0.000000e+00> : vector<8x128xf32>
    %311 = tpu.matmul %310, %309, %cst_142 {dimension_numbers = #tpu.dot_dimension_numbers<[1], [0], [0], [1], [0, 0, 1, 1], [], []>} : vector<8x128xbf16>, vector<128x128xbf16>, vector<8x128xf32> -> vector<8x128xf32>
    %c0_143 = arith.constant 0 : index
    %c0_144 = arith.constant 0 : index
    %312 = vector.load %arg23[%c0_143, %c0_144] : memref<1x128xf32, #tpu.memory_space<vmem>>, vector<1x128xf32>
    %313 = vector.broadcast %312 : vector<1x128xf32> to vector<8x128xf32>
    %314 = arith.addf %311, %313 : vector<8x128xf32>
    %cst_145 = arith.constant 0.000000e+00 : f32
    %315 = vector.broadcast %cst_145 : f32 to vector<8x128xf32>
    %316 = arith.maximumf %314, %315 : vector<8x128xf32>
    %c0_146 = arith.constant 0 : index
    %c0_147 = arith.constant 0 : index
    %317 = vector.load %arg24[%c0_146, %c0_147] : memref<128x128xbf16, #tpu.memory_space<vmem>>, vector<128x128xbf16>
    %318 = arith.truncf %316 : vector<8x128xf32> to vector<8x128xbf16>
    %cst_148 = arith.constant dense<0.000000e+00> : vector<8x128xf32>
    %319 = tpu.matmul %318, %317, %cst_148 {dimension_numbers = #tpu.dot_dimension_numbers<[1], [0], [0], [1], [0, 0, 1, 1], [], []>} : vector<8x128xbf16>, vector<128x128xbf16>, vector<8x128xf32> -> vector<8x128xf32>
    %c0_149 = arith.constant 0 : index
    %c0_150 = arith.constant 0 : index
    %320 = vector.load %arg25[%c0_149, %c0_150] : memref<1x128xf32, #tpu.memory_space<vmem>>, vector<1x128xf32>
    %321 = vector.broadcast %320 : vector<1x128xf32> to vector<8x128xf32>
    %322 = arith.addf %319, %321 : vector<8x128xf32>
    %c0_151 = arith.constant 0 : index
    %c0_152 = arith.constant 0 : index
    %323 = vector.load %arg26[%c0_151, %c0_152] : memref<8x128xf32, #tpu.memory_space<vmem>>, vector<8x128xf32>
    tpu.vector_store %arg26[%c0_151, %c0_152], %322 {strides = array<i32>} : memref<8x128xf32, #tpu.memory_space<vmem>>, vector<8x128xf32>,
    return
  }
  func.func @transform_0(%arg0: i32) -> (i32, i32) {
    %c0_i32 = arith.constant 0 : i32
    %c0_i32_0 = arith.constant 0 : i32
    %c0_i32_1 = arith.constant 0 : i32
    return %c0_i32, %c0_i32_0 : i32, i32
  }
  func.func @transform_1(%arg0: i32) -> (i32, i32) {
    %c0_i32 = arith.constant 0 : i32
    %c0_i32_0 = arith.constant 0 : i32
    %c0_i32_1 = arith.constant 0 : i32
    return %c0_i32, %c0_i32_0 : i32, i32
  }
  func.func @transform_2(%arg0: i32) -> (i32, i32) {
    %c0_i32 = arith.constant 0 : i32
    %c0_i32_0 = arith.constant 0 : i32
    %c0_i32_1 = arith.constant 0 : i32
    return %c0_i32, %c0_i32_0 : i32, i32
  }
  func.func @transform_3(%arg0: i32) -> (i32, i32) {
    %c0_i32 = arith.constant 0 : i32
    %c0_i32_0 = arith.constant 0 : i32
    %c0_i32_1 = arith.constant 0 : i32
    return %c0_i32, %c0_i32_0 : i32, i32
  }
  func.func @transform_4(%arg0: i32) -> (i32, i32) {
    %c0_i32 = arith.constant 0 : i32
    %c0_i32_0 = arith.constant 0 : i32
    %c0_i32_1 = arith.constant 0 : i32
    return %c0_i32, %c0_i32_0 : i32, i32
  }
  func.func @transform_5(%arg0: i32) -> (i32, i32) {
    %c0_i32 = arith.constant 0 : i32
    %c0_i32_0 = arith.constant 0 : i32
    %c0_i32_1 = arith.constant 0 : i32
    return %c0_i32, %c0_i32_0 : i32, i32
  }
  func.func @transform_6(%arg0: i32) -> (i32, i32, i32) {
    %c0_i32 = arith.constant 0 : i32
    %c0_i32_0 = arith.constant 0 : i32
    %c0_i32_1 = arith.constant 0 : i32
    %c0_i32_2 = arith.constant 0 : i32
    return %c0_i32, %c0_i32_0, %c0_i32_1 : i32, i32, i32
  }
  func.func @transform_7(%arg0: i32) -> (i32, i32, i32) {
    %c0_i32 = arith.constant 0 : i32
    %c0_i32_0 = arith.constant 0 : i32
    %c0_i32_1 = arith.constant 0 : i32
    %c0_i32_2 = arith.constant 0 : i32
    return %c0_i32, %c0_i32_0, %c0_i32_1 : i32, i32, i32
  }
  func.func @transform_8(%arg0: i32) -> (i32, i32, i32) {
    %c0_i32 = arith.constant 0 : i32
    %c0_i32_0 = arith.constant 0 : i32
    %c0_i32_1 = arith.constant 0 : i32
    %c0_i32_2 = arith.constant 0 : i32
    return %c0_i32, %c0_i32_0, %c0_i32_1 : i32, i32, i32
  }
  func.func @transform_9(%arg0: i32) -> (i32, i32, i32) {
    %c0_i32 = arith.constant 0 : i32
    %c0_i32_0 = arith.constant 0 : i32
    %c0_i32_1 = arith.constant 0 : i32
    %c0_i32_2 = arith.constant 0 : i32
    return %c0_i32, %c0_i32_0, %c0_i32_1 : i32, i32, i32
  }
  func.func @transform_10(%arg0: i32) -> (i32, i32, i32) {
    %c0_i32 = arith.constant 0 : i32
    %c0_i32_0 = arith.constant 0 : i32
    %c0_i32_1 = arith.constant 0 : i32
    %c0_i32_2 = arith.constant 0 : i32
    return %c0_i32, %c0_i32_0, %c0_i32_1 : i32, i32, i32
  }
  func.func @transform_11(%arg0: i32) -> (i32, i32, i32) {
    %c0_i32 = arith.constant 0 : i32
    %c0_i32_0 = arith.constant 0 : i32
    %c0_i32_1 = arith.constant 0 : i32
    %c0_i32_2 = arith.constant 0 : i32
    return %c0_i32, %c0_i32_0, %c0_i32_1 : i32, i32, i32
  }
  func.func @transform_12(%arg0: i32) -> (i32, i32, i32) {
    %c0_i32 = arith.constant 0 : i32
    %c0_i32_0 = arith.constant 0 : i32
    %c0_i32_1 = arith.constant 0 : i32
    %c0_i32_2 = arith.constant 0 : i32
    return %c0_i32, %c0_i32_0, %c0_i32_1 : i32, i32, i32
  }
  func.func @transform_13(%arg0: i32) -> (i32, i32, i32) {
    %c0_i32 = arith.constant 0 : i32
    %c0_i32_0 = arith.constant 0 : i32
    %c0_i32_1 = arith.constant 0 : i32
    %c0_i32_2 = arith.constant 0 : i32
    return %c0_i32, %c0_i32_0, %c0_i32_1 : i32, i32, i32
  }
  func.func @transform_14(%arg0: i32) -> (i32, i32, i32) {
    %c0_i32 = arith.constant 0 : i32
    %c0_i32_0 = arith.constant 0 : i32
    %c0_i32_1 = arith.constant 0 : i32
    %c0_i32_2 = arith.constant 0 : i32
    return %c0_i32, %c0_i32_0, %c0_i32_1 : i32, i32, i32
  }
  func.func @transform_15(%arg0: i32) -> (i32, i32, i32) {
    %c0_i32 = arith.constant 0 : i32
    %c0_i32_0 = arith.constant 0 : i32
    %c0_i32_1 = arith.constant 0 : i32
    %c0_i32_2 = arith.constant 0 : i32
    return %c0_i32, %c0_i32_0, %c0_i32_1 : i32, i32, i32
  }
  func.func @transform_16(%arg0: i32) -> (i32, i32, i32) {
    %c0_i32 = arith.constant 0 : i32
    %c0_i32_0 = arith.constant 0 : i32
    %c0_i32_1 = arith.constant 0 : i32
    %c0_i32_2 = arith.constant 0 : i32
    return %c0_i32, %c0_i32_0, %c0_i32_1 : i32, i32, i32
  }
  func.func @transform_17(%arg0: i32) -> (i32, i32, i32) {
    %c0_i32 = arith.constant 0 : i32
    %c0_i32_0 = arith.constant 0 : i32
    %c0_i32_1 = arith.constant 0 : i32
    %c0_i32_2 = arith.constant 0 : i32
    return %c0_i32, %c0_i32_0, %c0_i32_1 : i32, i32, i32
  }
  func.func @transform_18(%arg0: i32) -> (i32, i32, i32) {
    %c0_i32 = arith.constant 0 : i32
    %c0_i32_0 = arith.constant 0 : i32
    %c0_i32_1 = arith.constant 0 : i32
    %c0_i32_2 = arith.constant 0 : i32
    return %c0_i32, %c0_i32_0, %c0_i32_1 : i32, i32, i32
  }
  func.func @transform_19(%arg0: i32) -> (i32, i32) {
    %c0_i32 = arith.constant 0 : i32
    %c0_i32_0 = arith.constant 0 : i32
    %c0_i32_1 = arith.constant 0 : i32
    return %c0_i32, %c0_i32_0 : i32, i32
  }
  func.func @transform_20(%arg0: i32) -> (i32, i32) {
    %c0_i32 = arith.constant 0 : i32
    %c0_i32_0 = arith.constant 0 : i32
    %c0_i32_1 = arith.constant 0 : i32
    return %c0_i32, %c0_i32_0 : i32, i32
  }
  func.func @transform_21(%arg0: i32) -> (i32, i32) {
    %c0_i32 = arith.constant 0 : i32
    %c0_i32_0 = arith.constant 0 : i32
    %c0_i32_1 = arith.constant 0 : i32
    return %c0_i32, %c0_i32_0 : i32, i32
  }
  func.func @transform_22(%arg0: i32) -> (i32, i32) {
    %c0_i32 = arith.constant 0 : i32
    %c0_i32_0 = arith.constant 0 : i32
    %c0_i32_1 = arith.constant 0 : i32
    return %c0_i32, %c0_i32_0 : i32, i32
  }
  func.func @transform_23(%arg0: i32) -> (i32, i32) {
    %c0_i32 = arith.constant 0 : i32
    %c0_i32_0 = arith.constant 0 : i32
    %c0_i32_1 = arith.constant 0 : i32
    return %c0_i32, %c0_i32_0 : i32, i32
  }
  func.func @transform_24(%arg0: i32) -> (i32, i32) {
    %c0_i32 = arith.constant 0 : i32
    %c0_i32_0 = arith.constant 0 : i32
    %c0_i32_1 = arith.constant 0 : i32
    return %c0_i32, %c0_i32_0 : i32, i32
  }
  func.func @transform_25(%arg0: i32) -> (i32, i32) {
    %c0_i32 = arith.constant 0 : i32
    %c0_i32_0 = arith.constant 0 : i32
    %c0_i32_1 = arith.constant 0 : i32
    return %c0_i32, %c0_i32_0 : i32, i32
  }
}

</mosaic_0001>

<bundles_post_ra>
// kernel: tpu_custom_call.1
= control target key start
LH: loop header
LB: loop body
LE: loop exit
PB: predicated region body
PF: predicated region fallthrough
CT: control target
= control target key end

     0   :  { %s4239_s0 = inlined_call_operand.hbm [shape: f32[16,128], index: 0, kind: input, shape index: {}]   ;;  %s4240_s1 = inlined_call_operand.hbm [shape: bf16[16,16], index: 1, kind: input, shape index: {}]   ;;  %s4241_s2 = inlined_call_operand.vmem [shape: f32[1,16], index: 2, kind: input, shape index: {}]   ;;  %s4242_s3 = inlined_call_operand.hbm [shape: bf16[8,16], index: 3, kind: input, shape index: {}]   ;;  %s4243_s4 = inlined_call_operand.hbm [shape: bf16[128,128], index: 4, kind: input, shape index: {}]   ;;  %s4244_s5 = inlined_call_operand.hbm [shape: f32[1,128], index: 5, kind: input, shape index: {}]   ;;  %s4245_s6 = inlined_call_operand.hbm [shape: bf16[2,128,128], index: 6, kind: input, shape index: {}]   ;;  %s4246_s7 = inlined_call_operand.hbm [shape: f32[2,1,128], index: 7, kind: input, shape index: {}]   ;;  %s4247_s8 = inlined_call_operand.hbm [shape: bf16[2,128,128], index: 8, kind: input, shape index: {}]   ;;  %s4248_s9 = inlined_call_operand.hbm [shape: f32[2,1,128], index: 9, kind: input, shape index: {}]   ;;  %s4249_s10 = inlined_call_operand.hbm [shape: bf16[2,128,384], index: 10, kind: input, shape index: {}]   ;;  %s4250_s11 = inlined_call_operand.hbm [shape: f32[2,1,384], index: 11, kind: input, shape index: {}]   ;;  %s4251_s12 = inlined_call_operand.hbm [shape: bf16[2,128,128], index: 12, kind: input, shape index: {}]   ;;  %s4252_s13 = inlined_call_operand.hbm [shape: f32[2,1,128], index: 13, kind: input, shape index: {}]   ;;  %s4253_s14 = inlined_call_operand.hbm [shape: bf16[2,128,128], index: 14, kind: input, shape index: {}]   ;;  %s4254_s15 = inlined_call_operand.hbm [shape: f32[2,1,128], index: 15, kind: input, shape index: {}]   ;;  %s4255_s16 = inlined_call_operand.hbm [shape: bf16[2,128,128], index: 16, kind: input, shape index: {}]   ;;  %s4256_s17 = inlined_call_operand.hbm [shape: f32[2,1,128], index: 17, kind: input, shape index: {}]   ;;  %s4257_s18 = inlined_call_operand.vmem [shape: f32[2,8,128], index: 18, kind: input, shape index: {}]   ;;  %s4258_s19 = inlined_call_operand.hbm [shape: bf16[128,128], index: 19, kind: input, shape index: {}]   ;;  %s4259_s20 = inlined_call_operand.vmem [shape: f32[1,128], index: 20, kind: input, shape index: {}]   ;;  %s4260_s21 = inlined_call_operand.hbm [shape: bf16[128,128], index: 21, kind: input, shape index: {}]   ;;  %s4261_s22 = inlined_call_operand.vmem [shape: f32[1,128], index: 22, kind: input, shape index: {}]   ;;  %s4262_s23 = inlined_call_operand.hbm [shape: bf16[128,128], index: 23, kind: input, shape index: {}]   ;;  %s4263_s24 = inlined_call_operand.vmem [shape: f32[1,128], index: 24, kind: input, shape index: {}]   ;;  %s4264_s25 = inlined_call_operand.hbm [shape: f32[8,128], index: 25, kind: output, shape index: {}]  }
   0x1   :  { %4265 = sst [smem:[#allocation47_spill]] %s4239_s0 }
   0x2   :  { %4266 = sst [smem:[#allocation48_spill]] %s4240_s1 }
   0x3   :  { %4267 = sst [smem:[#allocation49_spill]] %s4241_s2 }
   0x4   :  { %4268 = sst [smem:[#allocation50_spill]] %s4242_s3 }
   0x5   :  { %4269 = sst [smem:[#allocation51_spill]] %s4243_s4 }
   0x6   :  { %4270 = sst [smem:[#allocation52_spill]] %s4244_s5 }
   0x7   :  { %4271 = sst [smem:[#allocation53_spill]] %s4245_s6 }
   0x8   :  { %4272 = sst [smem:[#allocation54_spill]] %s4246_s7 }
   0x9   :  { %4273 = sst [smem:[#allocation55_spill]] %s4247_s8 }
   0xa   :  { %4274 = sst [smem:[#allocation56_spill]] %s4248_s9 }
   0xb   :  { %4275 = sst [smem:[#allocation57_spill]] %s4263_s24 }
   0xc   :  { %4276 = sst [smem:[#allocation58_spill]] %s4264_s25 }
   0xd   :  { %30 = vsyncpa [#allocation3], 0 }
   0xe   :  { %31 = vsyncpa [#allocation6], 0 }
   0xf   :  { %32 = vsyncpa [#allocation9], 0 }
  0x10   :  { %33 = vsyncpa [#allocation12], 0 }
  0x11   :  { %34 = vsyncpa [#allocation15], 0 }
  0x12   :  { %35 = vsyncpa [#allocation18], 0 }
  0x13   :  { %36 = vsyncpa [#allocation21], 0 }
  0x14   :  { %37 = vsyncpa [#allocation24], 0 }
  0x15   :  { %38 = vsyncpa [#allocation27], 0 }
  0x16   :  { %39 = vsyncpa [#allocation30], 0 }
  0x17   :  { %40 = vsyncpa [#allocation33], 0  ;;  %s4277_s6 = sld [smem:[#allocation48_spill]] }
  0x1d   :  { %s59_s30 = sshll.u32 %s4277_s6, 4  ;;  %s60_s30 = int_to_ptr.hbm [resolvable:$true] %s59_s30 }
  0x1e   :  { %41 = vsyncpa [#allocation4], 0  ;;  %s3836_s7 = smov [#allocation5]   ;;  %s4278_s8 = sld [smem:[#allocation51_spill]] }
  0x1f   :  { %s61_s3 = sshll.u32 %s3836_s7, 4  ;;  %s3837_s4 = smov 64   ;;  %s62_s3 = int_to_ptr.vmem [resolvable:$true] %s61_s3 }
  0x20   :  { %s3838_s28 = smov 4   ;;  %s3839_s9 = smov [#allocation8]  }
  0x21   :  { %67 = dma.hbm_to_vmem [thread:$0]  %s60_s30, 128, %s62_s3, [#allocation6], %s3837_s4, %s3837_s4, %s3838_s28  }
  0x22   :  { %s87_s5 = sshll.u32 %s3839_s9, 4  ;;  %s4279_s2 = sld [smem:[#allocation53_spill]]  ;;  %s88_s5 = int_to_ptr.vmem [resolvable:$true] %s87_s5 }
  0x23   :  { %s4280_s1 = sld [smem:[#allocation55_spill]]  ;;  %s3840_s25 = smov [#allocation11]  }
  0x24   :  { %s85_s27 = sshll.u32 %s4278_s8, 4  ;;  %s111_s24 = sshll.u32 %s3840_s25, 4  ;;  %s86_s27 = int_to_ptr.hbm [resolvable:$true] %s85_s27  ;;  %s112_s24 = int_to_ptr.vmem [resolvable:$true] %s111_s24 }
  0x25   :  { %93 = dma.hbm_to_vmem [thread:$0]  %s86_s27, 1024, %s88_s5, [#allocation9], %s3837_s4, %s3837_s4, %s3838_s28  }
  0x26   :  { %s3841_s30 = smov [#allocation14]   ;;  %s161_s29 = sshll.u32 %s4249_s10, 4  ;;  %s162_s29 = int_to_ptr.hbm [resolvable:$true] %s161_s29 }
  0x27   :  { %s137_s3 = sshll.u32 %s3841_s30, 4  ;;  %s3842_s27 = smov [#allocation17]   ;;  %s138_s3 = int_to_ptr.vmem [resolvable:$true] %s137_s3 }
  0x28   :  { %s109_s6 = sshll.u32 %s4279_s2, 4  ;;  %s163_s25 = sshll.u32 %s3842_s27, 4  ;;  %s110_s6 = int_to_ptr.hbm [resolvable:$true] %s109_s6  ;;  %s164_s25 = int_to_ptr.vmem [resolvable:$true] %s163_s25 }
  0x29   :  { %s135_s8 = sshll.u32 %s4280_s1, 4  ;;  %s187_s7 = sshll.u32 %s4251_s12, 4  ;;  %s136_s8 = int_to_ptr.hbm [resolvable:$true] %s135_s8  ;;  %s188_s7 = int_to_ptr.hbm [resolvable:$true] %s187_s7 }
  0x2a   :  { %117 = dma.hbm_to_vmem [thread:$0]  %s110_s6, 2048, %s112_s24, [#allocation12], %s3837_s4, %s3837_s4, %s3838_s28  }
  0x2b   :  { %143 = dma.hbm_to_vmem [thread:$0]  %s136_s8, 2048, %s138_s3, [#allocation15], %s3837_s4, %s3837_s4, %s3838_s28  }
  0x2c   :  { %s3843_s24 = smov 192   ;;  %s3844_s6 = smov 12  }
  0x2d   :  { %169 = dma.hbm_to_vmem [thread:$0]  %s162_s29, 6144, %s164_s25, [#allocation18], %s3843_s24, %s3843_s24, %s3844_s6  }
  0x2e   :  { %s3845_s26 = smov [#allocation20]   ;;  %s213_s9 = sshll.u32 %s4253_s14, 4  ;;  %s214_s9 = int_to_ptr.hbm [resolvable:$true] %s213_s9 }
  0x2f   :  { %s189_s1 = sshll.u32 %s3845_s26, 4  ;;  %s239_s12 = sshll.u32 %s4255_s16, 4  ;;  %s190_s1 = int_to_ptr.vmem [resolvable:$true] %s189_s1  ;;  %s240_s12 = int_to_ptr.hbm [resolvable:$true] %s239_s12 }
  0x30   :  { %195 = dma.hbm_to_vmem [thread:$0]  %s188_s7, 2048, %s190_s1, [#allocation21], %s3837_s4, %s3837_s4, %s3838_s28  }
  0x31   :  { %s3846_s0 = smov [#allocation23]   ;;  %s3847_s29 = smov [#allocation26]  }
  0x32   :  { %s215_s27 = sshll.u32 %s3846_s0, 4  ;;  %s241_s14 = sshll.u32 %s3847_s29, 4  ;;  %s216_s27 = int_to_ptr.vmem [resolvable:$true] %s215_s27  ;;  %s242_s14 = int_to_ptr.vmem [resolvable:$true] %s241_s14 }
  0x33   :  { %221 = dma.hbm_to_vmem [thread:$0]  %s214_s9, 2048, %s216_s27, [#allocation24], %s3837_s4, %s3837_s4, %s3838_s28  }
  0x34   :  { %s267_s2 = sshll.u32 %s4258_s19, 4  ;;  %s4281_s24 = sld [smem:[#allocation47_spill]]  ;;  %s268_s2 = int_to_ptr.hbm [resolvable:$true] %s267_s2 }
  0x35   :  { %247 = dma.hbm_to_vmem [thread:$0]  %s240_s12, 2048, %s242_s14, [#allocation27], %s3837_s4, %s3837_s4, %s3838_s28  }
  0x36   :  { %s3848_s26 = smov [#allocation29]   ;;  %s3849_s10 = smov [#allocation2]  }
  0x37   :  { %s269_s1 = sshll.u32 %s3848_s26, 4  ;;  %s48_s19 = sshll.u32 %s3849_s10, 4  ;;  %s270_s1 = int_to_ptr.vmem [resolvable:$true] %s269_s1  ;;  %s49_s19 = int_to_ptr.vmem [resolvable:$true] %s48_s19 }
  0x38   :  { %275 = dma.hbm_to_vmem [thread:$0]  %s268_s2, 1024, %s270_s1, [#allocation30], %s3837_s4, %s3837_s4, %s3838_s28  }
  0x39   :  { %s3850_s30 = smov 128   ;;  %s3851_s9 = smov 8  }
  0x3a   :  { %s46_s6 = sshll.u32 %s4281_s24, 4  ;;  %s4282_s12 = sld [smem:[#allocation50_spill]]  ;;  %s47_s6 = int_to_ptr.hbm [resolvable:$true] %s46_s6 }
  0x3b   :  { %54 = dma.hbm_to_vmem [thread:$0]  %s47_s6, 256, %s49_s19, [#allocation3], %s3850_s30, %s3850_s30, %s3851_s9  }
  0x3c   :  { %s3852_s27 = smov [#allocation7]   ;;  %s4283_s5 = sld [smem:[#allocation52_spill]] }
  0x3d   :  { %s77_s29 = sshll.u32 %s3852_s27, 4  ;;  %s3853_s2 = smov [#allocation10]   ;;  %s78_s29 = int_to_ptr.vmem [resolvable:$true] %s77_s29 }
  0x3e   :  { %s101_s7 = sshll.u32 %s3853_s2, 4  ;;  %s4284_s1 = sld [smem:[#allocation54_spill]]  ;;  %s102_s7 = int_to_ptr.vmem [resolvable:$true] %s101_s7 }
  0x3f   :  { %s3854_s10 = smov [#allocation13]   ;;  %s4285_s8 = sld [smem:[#allocation56_spill]] }
  0x40   :  { %s75_s0 = sshll.u32 %s4282_s12, 4  ;;  %s124_s19 = sshll.u32 %s3854_s10, 4  ;;  %s76_s0 = int_to_ptr.hbm [resolvable:$true] %s75_s0  ;;  %s125_s19 = int_to_ptr.vmem [resolvable:$true] %s124_s19 }
  0x41   :  { %80 = dma.hbm_to_vmem [thread:$0]  %s76_s0, 64, %s78_s29, [#allocation6]  }
  0x42   :  { %s99_s16 = sshll.u32 %s4283_s5, 4  ;;  %s3855_s12 = smov 16   ;;  %s100_s16 = int_to_ptr.hbm [resolvable:$true] %s99_s16 }
  0x43   :  { %104 = dma.hbm_to_vmem [thread:$0]  %s100_s16, 16, %s102_s7, [#allocation9]  }
  0x44   :  { %s122_s6 = sshll.u32 %s4284_s1, 4  ;;  %s3856_s27 = smov 1   ;;  %s123_s6 = int_to_ptr.hbm [resolvable:$true] %s122_s6 }
  0x45   :  { %s148_s3 = sshll.u32 %s4285_s8, 4  ;;  %s3857_s0 = smov [#allocation16]   ;;  %s149_s3 = int_to_ptr.hbm [resolvable:$true] %s148_s3 }
  0x46   :  { %130 = dma.hbm_to_vmem [thread:$0]  %s123_s6, 32, %s125_s19, [#allocation12], %s3855_s12, %s3855_s12, %s3856_s27  }
  0x47   :  { %s150_s29 = sshll.u32 %s3857_s0, 4  ;;  %s174_s5 = sshll.u32 %s4250_s11, 4  ;;  %s151_s29 = int_to_ptr.vmem [resolvable:$true] %s150_s29  ;;  %s175_s5 = int_to_ptr.hbm [resolvable:$true] %s174_s5 }
  0x48   :  { %156 = dma.hbm_to_vmem [thread:$0]  %s149_s3, 32, %s151_s29, [#allocation15], %s3855_s12, %s3855_s12, %s3856_s27  }
  0x49   :  { %s3858_s16 = smov [#allocation19]   ;;  %s200_s26 = sshll.u32 %s4252_s13, 4  ;;  %s201_s26 = int_to_ptr.hbm [resolvable:$true] %s200_s26 }
  0x4a   :  { %s176_s2 = sshll.u32 %s3858_s16, 4  ;;  %s3859_s1 = smov 48   ;;  %s177_s2 = int_to_ptr.vmem [resolvable:$true] %s176_s2 }
  0x4b   :  { %s3860_s6 = smov 3   ;;  %s3861_s10 = smov [#allocation22]  }
  0x4c   :  { %182 = dma.hbm_to_vmem [thread:$0]  %s175_s5, 96, %s177_s2, [#allocation18], %s3859_s1, %s3859_s1, %s3860_s6  }
  0x4d   :  { %s202_s19 = sshll.u32 %s3861_s10, 4  ;;  %s226_s9 = sshll.u32 %s4254_s15, 4  ;;  %s203_s19 = int_to_ptr.vmem [resolvable:$true] %s202_s19  ;;  %s227_s9 = int_to_ptr.hbm [resolvable:$true] %s226_s9 }
  0x4e   :  { %208 = dma.hbm_to_vmem [thread:$0]  %s201_s26, 32, %s203_s19, [#allocation21], %s3855_s12, %s3855_s12, %s3856_s27  }
  0x4f   :  { %s252_s13 = sshll.u32 %s4256_s17, 4  ;;  %s3862_s0 = smov [#allocation25]   ;;  %s253_s13 = int_to_ptr.hbm [resolvable:$true] %s252_s13 }
  0x50   :  { %s228_s29 = sshll.u32 %s3862_s0, 4  ;;  %s3863_s14 = smov [#allocation28]   ;;  %s229_s29 = int_to_ptr.vmem [resolvable:$true] %s228_s29 }
  0x51   :  { %234 = dma.hbm_to_vmem [thread:$0]  %s227_s9, 32, %s229_s29, [#allocation24], %s3855_s12, %s3855_s12, %s3856_s27  }
  0x52   :  { %s254_s15 = sshll.u32 %s3863_s14, 4  ;;  %s282_s16 = sshll.u32 %s4260_s21, 4  ;;  %s255_s15 = int_to_ptr.vmem [resolvable:$true] %s254_s15  ;;  %s283_s16 = int_to_ptr.hbm [resolvable:$true] %s282_s16 }
  0x53   :  { %260 = dma.hbm_to_vmem [thread:$0]  %s253_s13, 32, %s255_s15, [#allocation27], %s3855_s12, %s3855_s12, %s3856_s27  }
  0x54   :  { %s297_s7 = sshll.u32 %s4262_s23, 4  ;;  %s3864_s24 = smov [#allocation31]   ;;  %s298_s7 = int_to_ptr.hbm [resolvable:$true] %s297_s7 }
  0x55   :  { %s284_s26 = sshll.u32 %s3864_s24, 4  ;;  %s3865_s1 = smov [#allocation32]   ;;  %s285_s26 = int_to_ptr.vmem [resolvable:$true] %s284_s26 }
  0x56   :  { %290 = dma.hbm_to_vmem [thread:$0]  %s283_s16, 1024, %s285_s26, [#allocation30], %s3837_s4, %s3837_s4, %s3838_s28  }
  0x57   :  { %s299_s21 = sshll.u32 %s3865_s1, 4  ;;  %s300_s21 = int_to_ptr.vmem [resolvable:$true] %s299_s21 }
  0x58   :  { %305 = dma.hbm_to_vmem [thread:$0]  %s298_s7, 1024, %s300_s21, [#allocation33], %s3837_s4, %s3837_s4, %s3838_s28  }
  0x59   :  { %3812 = dma.done.wait [#allocation3], 256  }
  0x5a   :  { %3813 = vsyncadd [#allocation3], 4294967040 }
  0x5b   :  { %3814 = dma.done.wait [#allocation6], 192  }
  0x5c   :  { %3815 = vsyncadd [#allocation6], 4294967104 }
  0x5d   :  { %3816 = dma.done.wait [#allocation9], 1040  }
  0x5e   :  { %3817 = vsyncadd [#allocation9], 4294966256 }
  0x5f   :  { %3818 = dma.done.wait [#allocation12], 2080  }
  0x60   :  { %3819 = vsyncadd [#allocation12], 4294965216 }
  0x61   :  { %3820 = dma.done.wait [#allocation15], 2080  }
  0x62   :  { %3821 = vsyncadd [#allocation15], 4294965216 }
  0x63   :  { %3822 = dma.done.wait [#allocation18], 6240  }
  0x64   :  { %3823 = vsyncadd [#allocation18], 4294961056 }
  0x65   :  { %3824 = dma.done.wait [#allocation21], 2080  }
  0x66   :  { %3825 = vsyncadd [#allocation21], 4294965216 }
  0x67   :  { %3826 = dma.done.wait [#allocation24], 2080  }
  0x68   :  { %3827 = vsyncadd [#allocation24], 4294965216 }
  0x69   :  { %3828 = dma.done.wait [#allocation27], 2080  }
  0x6a   :  { %3829 = vsyncadd [#allocation27], 4294965216 }
  0x6b   :  { %3830 = dma.done.wait [#allocation30], 2048  }
  0x6c   :  { %3831 = vsyncadd [#allocation30], 4294965248 }
  0x6d   :  { %3832 = dma.done.wait [#allocation33], 1024  }
  0x6e   :  { %3833 = vsyncadd [#allocation33], 4294966272  ;;  %v3076_v0 = vld [vmem:[#allocation8 + $0x38] sm:$0xff]  ;;  %v3075_v1 = vld [vmem:[#allocation8 + $0x30] sm:$0xff]  ;;  %vm604_vm0 = vcmask 130048   ;;  %s4286_s28 = sld [smem:[#allocation49_spill]] }
  0x6f   :  { %465 = vmatpush.bf16.msra.mxu0 %v3076_v0  ;;  %v3074_v2 = vld [vmem:[#allocation8 + $0x28] sm:$0xff]  ;;  %v3073_v3 = vld [vmem:[#allocation8 + $0x20] sm:$0xff]  ;;  %v3072_v4 = vld [vmem:[#allocation8 + $0x18] sm:$0xff]  ;;  %s4287_s8 = sld [smem:[#allocation57_spill]]  ;;  %s3867_s3 = smov [#allocation34]  }
  0x70   :  { %v3071_v5 = vld [vmem:[#allocation8 + $0x10] sm:$0xff]  ;;  %v3070_v6 = vld [vmem:[#allocation8 + $0x8] sm:$0xff]  ;;  %v2603_v8 = vld [vmem:[#allocation17 + $0xb4] sm:$0xf0]  ;;  %s2392_s13 = sshll.u32 %s3867_s3, 4  ;;  %s4288_s14 = sld [smem:[#allocation58_spill]]  ;;  %s2393_s13 = int_to_ptr.vmem [resolvable:$true] %s2392_s13 }
  0x71   :  { %v3098_v7 = vld [vmem:[#allocation17 + $0xac] sm:$0xf]  ;;  %v3069_v9 = vld [vmem:[#allocation8] sm:$0xff]  ;;  %v3095_v13 = vld [vmem:[#allocation17 + $0x94] sm:$0xf] }
  0x72   :  { %v394_v10 = vld [vmem:[#allocation2] sm:$0xff]  ;;  %v395_v11 = vld [vmem:[#allocation2 + $0x8] sm:$0xff]  ;;  %v2606_v12 = vor.u32 %v3098_v7, %v2603_v8  ;;  %v2567_v21 = vld [vmem:[#allocation17 + $0x6c] sm:$0xf0] }
  0x73   :  { %466 = vmatpush.bf16.msra.mxu0 %v3075_v1  ;;  %v2591_v14 = vld [vmem:[#allocation17 + $0x9c] sm:$0xf0]  ;;  %v412_v15 = vpack.c.bf16 %v395_v11, %v394_v10  ;;  %v3092_v17 = vld [vmem:[#allocation17 + $0x7c] sm:$0xf]  ;;  %v2579_v18 = vld [vmem:[#allocation17 + $0x84] sm:$0xf0] }
  0x74   :  { %v2594_v16 = vor.u32 %v3095_v13, %v2591_v14  ;;  %v2582_v19 = vor.u32 %v3092_v17, %v2579_v18  ;;  %v3089_v20 = vld [vmem:[#allocation17 + $0x64] sm:$0xf]  ;;  %v3086_v23 = vld [vmem:[#allocation17 + $0x4c] sm:$0xf]  ;;  %v2555_v24 = vld [vmem:[#allocation17 + $0x54] sm:$0xf0] }
  0x75   :  { %v2570_v22 = vor.u32 %v3089_v20, %v2567_v21  ;;  %v2558_v25 = vor.u32 %v3086_v23, %v2555_v24  ;;  %v3083_v26 = vld [vmem:[#allocation17 + $0x34] sm:$0xf]  ;;  %v2543_v27 = vld [vmem:[#allocation17 + $0x3c] sm:$0xf0]  ;;  %v3080_v29 = vld [vmem:[#allocation17 + $0x1c] sm:$0xf] }
  0x76   :  { %v2546_v28 = vor.u32 %v3083_v26, %v2543_v27  ;;  %v2531_v30 = vld [vmem:[#allocation17 + $0x24] sm:$0xf0]  ;;  %v3077_v32 = vld [vmem:[#allocation17 + $0x4] sm:$0xf]  ;;  %v2519_v33 = vld [vmem:[#allocation17 + $0xc] sm:$0xf0] }
  0x77   :  { %467 = vmatpush.bf16.msra.mxu0 %v3074_v2  ;;  %v2534_v31 = vor.u32 %v3080_v29, %v2531_v30  ;;  %v2522_v34 = vor.u32 %v3077_v32, %v2519_v33  ;;  %v3261_v36 = vld [vmem:[#allocation10] ss:$0 sm:$0xff]  ;;  %v2601_v37 = vld [vmem:[#allocation17 + $0xa8] sm:$0xf]  ;;  %v3099_v38 = vld [vmem:[#allocation17 + $0xb0] sm:$0xf0] }
  0x78   :  { %v2602_v42 = vor.u32 %v3099_v38, %v2601_v37  ;;  %v2589_v44 = vld [vmem:[#allocation17 + $0x90] sm:$0xf]  ;;  %v3096_v45 = vld [vmem:[#allocation17 + $0x98] sm:$0xf0]  ;;  %v3108_v47 = vld [vmem:[#allocation11 + $0x38] sm:$0xff]  ;;  %s2394_s15 = sshll.u32 %s4288_s14, 4  ;;  %s2395_s15 = int_to_ptr.hbm [resolvable:$true] %s2394_s15 }
  0x79   :  { %v4111_v46 = vld [vmem:[#allocation5] sm:$0xff]  ;;  %v2590_v48 = vor.u32 %v3096_v45, %v2589_v44  ;;  %v3116_v49 = vld [vmem:[#allocation14 + $0x38] sm:$0xff]  ;;  %v3093_v51 = vld [vmem:[#allocation17 + $0x80] sm:$0xf0]  ;;  %674 = vmatpush.bf16.msra.mxu2 %v3108_v47 }
  0x7a   :  { %v2577_v50 = vld [vmem:[#allocation17 + $0x78] sm:$0xf]  ;;  %v3107_v52 = vld [vmem:[#allocation11 + $0x30] sm:$0xff]  ;;  %742 = vmatpush.bf16.msra.mxu3 %v3116_v49  ;;  %v2565_v55 = vld [vmem:[#allocation17 + $0x60] sm:$0xf] }
  0x7b   :  { %468 = vmatpush.bf16.msra.mxu0 %v3073_v3  ;;  %v3115_v53 = vld [vmem:[#allocation14 + $0x30] sm:$0xff]  ;;  %v2578_v54 = vor.u32 %v3093_v51, %v2577_v50  ;;  %v3106_v57 = vld [vmem:[#allocation11 + $0x28] sm:$0xff]  ;;  %v3105_v62 = vld [vmem:[#allocation11 + $0x20] sm:$0xff] }
  0x7c   :  { %v3090_v56 = vld [vmem:[#allocation17 + $0x68] sm:$0xf0]  ;;  %v2553_v60 = vld [vmem:[#allocation17 + $0x48] sm:$0xf]  ;;  %v3087_v61 = vld [vmem:[#allocation17 + $0x50] sm:$0xf0] }
  0x7d   :  { %675 = vmatpush.bf16.msra.mxu2 %v3107_v52  ;;  %v3114_v58 = vld [vmem:[#allocation14 + $0x28] sm:$0xff]  ;;  %v2566_v59 = vor.u32 %v3090_v56, %v2565_v55  ;;  %v3113_v63 = vld [vmem:[#allocation14 + $0x20] sm:$0xff]  ;;  %v2554_v0 = vor.u32 %v3087_v61, %v2553_v60  ;;  %v2541_v1 = vld [vmem:[#allocation17 + $0x30] sm:$0xf] }
  0x7e   :  { %743 = vmatpush.bf16.msra.mxu3 %v3115_v53  ;;  %v3084_v2 = vld [vmem:[#allocation17 + $0x38] sm:$0xf0]  ;;  %v3104_v3 = vld [vmem:[#allocation11 + $0x18] sm:$0xff]  ;;  %v3081_v7 = vld [vmem:[#allocation17 + $0x20] sm:$0xf0] }
  0x7f   :  { %469 = vmatpush.bf16.msra.mxu0 %v3072_v4  ;;  %v3112_v4 = vld [vmem:[#allocation14 + $0x18] sm:$0xff]  ;;  %v3103_v8 = vld [vmem:[#allocation11 + $0x10] sm:$0xff]  ;;  %v2517_v10 = vld [vmem:[#allocation17] sm:$0xf] }
  0x80   :  { %v3078_v11 = vld [vmem:[#allocation17 + $0x8] sm:$0xf0]  ;;  %v3101_v14 = vld [vmem:[#allocation11] sm:$0xff]  ;;  %v3097_v20 = vld [vmem:[#allocation17 + $0xa0] sm:$0xf0] }
  0x81   :  { %676 = vmatpush.bf16.msra.mxu2 %v3106_v57  ;;  %v2518_v13 = vor.u32 %v3078_v11, %v2517_v10  ;;  %v3111_v18 = vld [vmem:[#allocation14 + $0x10] sm:$0xff]  ;;  %v2585_v23 = vld [vmem:[#allocation17 + $0x80] sm:$0xf]  ;;  %v2573_v27 = vld [vmem:[#allocation17 + $0x68] sm:$0xf]  ;;  %v3866_v10 = vmov 0.0  }
  0x82   :  { %744 = vmatpush.bf16.msra.mxu3 %v3114_v58  ;;  %v3094_v24 = vld [vmem:[#allocation17 + $0x88] sm:$0xf0]  ;;  %v3109_v26 = vld [vmem:[#allocation14] sm:$0xff]  ;;  %v2561_v30 = vld [vmem:[#allocation17 + $0x50] sm:$0xf] }
  0x83   :  { %470 = vmatpush.bf16.msra.mxu0 %v3071_v5  ;;  %v2542_v5 = vor.u32 %v3084_v2, %v2541_v1  ;;  %v2549_v33 = vld [vmem:[#allocation17 + $0x38] sm:$0xf]  ;;  %v3082_v37 = vld [vmem:[#allocation17 + $0x28] sm:$0xf0]  ;;  %v546_v47 = vld [vmem:[#allocation19] sm:$0x7]  ;;  %v392_v2 = vlaneseq }
  0x84   :  { %v766_v49 = vperm.slane %v546_v47, 1 }
  0x85   :  { %677 = vmatpush.bf16.msra.mxu2 %v3105_v62 }
  0x86   :  { %745 = vmatpush.bf16.msra.mxu3 %v3113_v63 }
  0x87   :  { %471 = vmatpush.bf16.msra.mxu0 %v3070_v6  ;;  %v2529_v6 = vld [vmem:[#allocation17 + $0x18] sm:$0xf] }
  0x89   :  { %678 = vmatpush.bf16.msra.mxu2 %v3104_v3 }
  0x8a   :  { %746 = vmatpush.bf16.msra.mxu3 %v3112_v4 }
  0x8b   :  { %472 = vmatpush.bf16.msra.mxu0 %v3069_v9  ;;  %v2530_v9 = vor.u32 %v3081_v7, %v2529_v6  ;;  %v765_v7 = vperm.slane %v546_v47, 0 }
  0x8d   :  { %679 = vmatpush.bf16.msra.mxu2 %v3103_v8 }
  0x8e   :  { %473 = vmatmul.bf16.vlgmr.msra.gmra.mxu0 %v412_v15  ;;  %v2609_v15 = vld [vmem:[#allocation17 + $0xb0] sm:$0xf]  ;;  %747 = vmatpush.bf16.msra.mxu3 %v3111_v18 }
  0x8f   :  { %913 = vmatpush.bf16.msrb.mxu0 %v2606_v12  ;;  %v3102_v12 = vld [vmem:[#allocation11 + $0x8] sm:$0xff] }
  0x91   :  { %680 = vmatpush.bf16.msra.mxu2 %v3102_v12 }
  0x93   :  { %914 = vmatpush.bf16.msrb.mxu0 %v2594_v16  ;;  %v3100_v16 = vld [vmem:[#allocation17 + $0xb8] sm:$0xf0] }
  0x94   :  { %v2610_v17 = vor.u32 %v3100_v16, %v2609_v15 }
  0x95   :  { %681 = vmatpush.bf16.msra.mxu2 %v3101_v14 }
  0x97   :  { %915 = vmatpush.bf16.msrb.mxu0 %v2582_v19  ;;  %v2597_v19 = vld [vmem:[#allocation17 + $0x98] sm:$0xf] }
  0x98   :  { %v2598_v21 = vor.u32 %v3097_v20, %v2597_v19 }
  0x99   :  { %927 = vmatpush.bf16.msrb.mxu2 %v2610_v17 }
  0x9b   :  { %916 = vmatpush.bf16.msrb.mxu0 %v2570_v22  ;;  %v3110_v22 = vld [vmem:[#allocation14 + $0x8] sm:$0xff] }
  0x9c   :  { %748 = vmatpush.bf16.msra.mxu3 %v3110_v22 }
  0x9d   :  { %928 = vmatpush.bf16.msrb.mxu2 %v2598_v21 }
  0x9f   :  { %917 = vmatpush.bf16.msrb.mxu0 %v2558_v25  ;;  %v2586_v25 = vor.u32 %v3094_v24, %v2585_v23 }
  0xa0   :  { %749 = vmatpush.bf16.msra.mxu3 %v3109_v26 }
  0xa1   :  { %929 = vmatpush.bf16.msrb.mxu2 %v2586_v25  ;;  %v4136_v25 = vld [vmem:[%s4286_s28] ss:$0 sm:$0xff] }
  0xa3   :  { %918 = vmatpush.bf16.msrb.mxu0 %v2546_v28  ;;  %v3091_v28 = vld [vmem:[#allocation17 + $0x70] sm:$0xf0] }
  0xa4   :  { %v2574_v29 = vor.u32 %v3091_v28, %v2573_v27 }
  0xa6   :  { %930 = vmatpush.bf16.msrb.mxu2 %v2574_v29 }
  0xa7   :  { %919 = vmatpush.bf16.msrb.mxu0 %v2534_v31  ;;  %v3088_v31 = vld [vmem:[#allocation17 + $0x58] sm:$0xf0] }
  0xa8   :  { %v2562_v32 = vor.u32 %v3088_v31, %v2561_v30 }
  0xaa   :  { %931 = vmatpush.bf16.msrb.mxu2 %v2562_v32 }
  0xab   :  { %920 = vmatpush.bf16.msrb.mxu0 %v2522_v34  ;;  %v3085_v34 = vld [vmem:[#allocation17 + $0x40] sm:$0xf0] }
 0x10b   :  { %v474_v35 = vpop.f32.mrf.mxu0 }
 0x10c   :  { %v4103_v40 = vadd.f32 %v3261_v36, %v474_v35  ;;  %v2550_v35 = vor.u32 %v3085_v34, %v2549_v33 }
 0x10e   :  { %932 = vmatpush.bf16.msrb.mxu2 %v2550_v35 }
 0x113   :  { %v476_v39 = vpop.f32.mrf.mxu0 }
 0x114   :  { %v4105_v41 = vadd.f32 %v3261_v36, %v476_v39  ;;  %v2537_v36 = vld [vmem:[#allocation17 + $0x20] sm:$0xf]  ;;  %v2525_v39 = vld [vmem:[#allocation17 + $0x8] sm:$0xf] }
 0x115   :  { %v2538_v38 = vor.u32 %v3082_v37, %v2537_v36 }
 0x116   :  { %v4109_v43 = vpack.c.bf16 %v4105_v41, %v4103_v40 }
 0x117   :  { %933 = vmatpush.bf16.msrb.mxu2 %v2538_v38 }
 0x118   :  { %615 = vmatpush.bf16.msra.mxu1 %v4109_v43  ;;  %921 = vmatmul.bf16.vlgmr.msrb.gmra.mxu0 %v4109_v43 }
 0x11b   :  { %2450 = vmatmul.msk.bf16.vlgmr.msra.gmra.mxu1 %vm604_vm0, %v4111_v46 }
 0x11c   :  { %899 = vmatpush.bf16.msrb.mxu1 %v2602_v42  ;;  %v3079_v42 = vld [vmem:[#allocation17 + $0x10] sm:$0xf0] }
 0x11d   :  { %v2526_v44 = vor.u32 %v3079_v42, %v2525_v39 }
 0x11f   :  { %934 = vmatpush.bf16.msrb.mxu2 %v2526_v44 }
 0x120   :  { %900 = vmatpush.bf16.msrb.mxu1 %v2590_v48 }
 0x124   :  { %901 = vmatpush.bf16.msrb.mxu1 %v2578_v54 }
 0x128   :  { %902 = vmatpush.bf16.msrb.mxu1 %v2566_v59  ;;  %v3262_v59 = vld [vmem:[#allocation13] ss:$0 sm:$0xff] }
 0x12c   :  { %903 = vmatpush.bf16.msrb.mxu1 %v2554_v0 }
 0x130   :  { %904 = vmatpush.bf16.msrb.mxu1 %v2542_v5  ;;  %v393_v5 = vand.u32 127, %v392_v2 }
 0x132   :  { %vm944_vm1 = vcmp.lt.s32.totalorder %v393_v5, 16  ;;  %vm1016_vm2 = vcmp.ge.s32.totalorder %v393_v5, 16  ;;  %vm1017_vm3 = vcmp.lt.s32.totalorder %v393_v5, 32 }
 0x133   :  { %v4121_v11 = vsel %vm944_vm1, 1.0, %v3866_v10  ;;  %vm1018_vm4 = vmand %vm1016_vm2, %vm1017_vm3 }
 0x134   :  { %905 = vmatpush.bf16.msrb.mxu1 %v2530_v9  ;;  %v767_v9 = vperm.slane %v546_v47, 2  ;;  %v4125_v19 = vsel %vm1018_vm4, 1.0, %v3866_v10 }
 0x138   :  { %906 = vmatpush.bf16.msrb.mxu1 %v2518_v13 }
 0x13b   :  { %907 = vmatmul.bf16.vlgmr.msrb.gmra.mxu1 %v4109_v43 }
 0x195   :  { %v922_v45 = vpop.f32.mrf.mxu0 }
 0x196   :  { %v923_v51 = vadd.f32 %v922_v45, %v766_v49 }
 0x198   :  { %v617_v48 = vpop.f32.mrf.mxu1 }
 0x199   :  { %v618_v55 = vadd.f32 %v617_v48, %v4103_v40 }
 0x19d   :  { %v924_v50 = vpop.f32.mrf.mxu0 }
 0x19e   :  { %v925_v52 = vadd.f32 %v924_v50, %v766_v49 }
 0x1a0   :  { %v619_v53 = vpop.f32.mrf.mxu1  ;;  %v941_v54 = vpack.c.bf16 %v925_v52, %v923_v51 }
 0x1a1   :  { %v620_v56 = vadd.f32 %v619_v53, %v4105_v41 }
 0x1a2   :  { %958 = vmatpush.bf16.xpose.msrb.mxu3 %v941_v54 }
 0x1a3   :  { %v622_v57 = vpack.c.bf16 %v620_v56, %v618_v55 }
 0x1a5   :  { %682 = vmatmul.bf16.vlgmr.msra.gmra.mxu2 %v622_v57 }
 0x1b5   :  { %935 = vmatmul.bf16.vlgmr.msrb.gmra.mxu2 %v4109_v43 }
 0x1b8   :  { %v908_v61 = vpop.f32.mrf.mxu1 }
 0x1b9   :  { %v909_v43 = vadd.f32 %v908_v61, %v765_v7 }
 0x1bb   :  { %v948_v16 = vmul.f32 %v4121_v11, %v909_v43  ;;  %v1021_v21 = vmul.f32 %v4125_v19, %v909_v43 }
 0x1c0   :  { %v910_v6 = vpop.f32.mrf.mxu1 }
 0x1c1   :  { %v911_v8 = vadd.f32 %v910_v6, %v765_v7 }
 0x1c3   :  { %v949_v13 = vmul.f32 %v4121_v11, %v911_v8  ;;  %v1022_v20 = vmul.f32 %v4125_v19, %v911_v8 }
 0x1c5   :  { %v950_v18 = vpack.c.bf16 %v949_v13, %v948_v16  ;;  %v1023_v22 = vpack.c.bf16 %v1022_v20, %v1021_v21  ;;  %v3124_v16 = vld [vmem:[#allocation20 + $0x38] sm:$0xff]  ;;  %v3121_v20 = vld [vmem:[#allocation20 + $0x20] sm:$0xff] }
 0x1c6   :  { %1138 = vmatpush.bf16.msra.mxu0 %v3124_v16  ;;  %v3120_v21 = vld [vmem:[#allocation20 + $0x18] sm:$0xff] }
 0x1c7   :  { %v3136_v16 = vld [vmem:[#allocation26 + $0x18] sm:$0xff] }
 0x228   :  { %v683_v58 = vpop.f32.mrf.mxu2 }
 0x229   :  { %v684_v60 = vadd.f32 %v3262_v59, %v683_v58 }
 0x22b   :  { %v688_v0 = vmax.f32 %v684_v60, 0.0 }
 0x230   :  { %v685_v62 = vpop.f32.mrf.mxu2 }
 0x231   :  { %v686_v63 = vadd.f32 %v3262_v59, %v685_v62 }
 0x233   :  { %v689_v1 = vmax.f32 %v686_v63, 0.0 }
 0x235   :  { %v690_v3 = vpack.c.bf16 %v689_v1, %v688_v0 }
 0x237   :  { %750 = vmatmul.bf16.vlgmr.msra.gmra.mxu3 %v690_v3 }
 0x238   :  { %1031 = vmatpush.bf16.xpose.msra.mxu3 %v941_v54  ;;  %v936_v4 = vpop.f32.mrf.mxu2 }
 0x239   :  { %v937_v14 = vadd.f32 %v936_v4, %v767_v9 }
 0x240   :  { %v938_v12 = vpop.f32.mrf.mxu2 }
 0x241   :  { %v939_v15 = vadd.f32 %v938_v12, %v767_v9 }
 0x243   :  { %v942_v17 = vpack.c.bf16 %v939_v15, %v937_v14 }
 0x245   :  { %1005 = vmatpush.bf16.msra.mxu1 %v942_v17 }
 0x247   :  { %959 = vmatmul.bf16.vlgmr.msrb.gmra.mxu3 %v950_v18  ;;  %v3122_v18 = vld [vmem:[#allocation20 + $0x28] sm:$0xff] }
 0x249   :  { %1075 = vmatpush.bf16.msrb.mxu1 %v942_v17  ;;  %v3123_v17 = vld [vmem:[#allocation20 + $0x30] sm:$0xff] }
 0x24a   :  { %1139 = vmatpush.bf16.msra.mxu0 %v3123_v17  ;;  %v3135_v17 = vld [vmem:[#allocation26 + $0x10] sm:$0xff] }
 0x24e   :  { %1140 = vmatpush.bf16.msra.mxu0 %v3122_v18  ;;  %v3134_v18 = vld [vmem:[#allocation26 + $0x8] sm:$0xff] }
 0x252   :  { %1141 = vmatpush.bf16.msra.mxu0 %v3121_v20  ;;  %v2863_v20 = vld [vmem:[#allocation17 + $0x168] sm:$0xf] }
 0x256   :  { %1142 = vmatpush.bf16.msra.mxu0 %v3120_v21  ;;  %v3163_v21 = vld [vmem:[#allocation17 + $0x170] sm:$0xf0] }
 0x257   :  { %1032 = vmatmul.bf16.vlgmr.msra.gmra.mxu3 %v1023_v22  ;;  %v3119_v22 = vld [vmem:[#allocation20 + $0x10] sm:$0xff] }
 0x25a   :  { %1143 = vmatpush.bf16.msra.mxu0 %v3119_v22  ;;  %v3162_v22 = vld [vmem:[#allocation17 + $0x16c] sm:$0xf] }
 0x2ba   :  { %v4129_v23 = vpop.f32.mrf.mxu3 }
 0x2c2   :  { %v4131_v24 = vpop.f32.mrf.mxu3 }
 0x2ca   :  { %v960_v26 = vpop.f32.mrf.mxu3 }
 0x2cb   :  { %v965_v27 = vmul.f32 0.25, %v960_v26  ;;  %v3118_v26 = vld [vmem:[#allocation20 + $0x8] sm:$0xff] }
 0x2cc   :  { %1144 = vmatpush.bf16.msra.mxu0 %v3118_v26  ;;  %v2864_v26 = vor.u32 %v3163_v21, %v2863_v20 }
 0x2cd   :  { %v970_v28 = vadd.f32 %v4136_v25, %v965_v27  ;;  %v3117_v27 = vld [vmem:[#allocation20] sm:$0xff] }
 0x2cf   :  { %v972_v29 = vsel %vm604_vm0, %v970_v28, -inf }
 0x2d0   :  { %973 = vmax.xlane.f32.xlu0 %v972_v29  ;;  %1145 = vmatpush.bf16.msra.mxu0 %v3117_v27  ;;  %v2865_v27 = vld [vmem:[#allocation17 + $0x174] sm:$0xf0] }
 0x2d2   :  { %v962_v30 = vpop.f32.mrf.mxu3 }
 0x2d3   :  { %v966_v31 = vmul.f32 0.25, %v962_v30  ;;  %v3131_v30 = vld [vmem:[#allocation23 + $0x30] sm:$0xff] }
 0x2d5   :  { %v971_v32 = vadd.f32 %v4136_v25, %v966_v31  ;;  %v3130_v31 = vld [vmem:[#allocation23 + $0x28] sm:$0xff] }
 0x2d7   :  { %v975_v33 = vsel %vm604_vm0, %v971_v32, -inf }
 0x2d8   :  { %976 = vmax.xlane.f32.xlu0 %v975_v33 }
 0x2da   :  { %v1033_v34 = vpop.f32.mrf.mxu3 }
 0x2db   :  { %v1038_v35 = vmul.f32 0.25, %v1033_v34 }
 0x2dd   :  { %v1040_v36 = vadd.f32 %v4136_v25, %v1038_v35 }
 0x2df   :  { %v1042_v37 = vsel %vm604_vm0, %v1040_v36, -inf }
 0x2e0   :  { %1043 = vmax.xlane.f32.xlu1 %v1042_v37 }
 0x2e2   :  { %v1035_v38 = vpop.f32.mrf.mxu3 }
 0x2e3   :  { %v1039_v39 = vmul.f32 0.25, %v1035_v38 }
 0x2e5   :  { %v1041_v42 = vadd.f32 %v4136_v25, %v1039_v39 }
 0x2e7   :  { %v1045_v44 = vsel %vm604_vm0, %v1041_v42, -inf }
 0x2e8   :  { %1046 = vmax.xlane.f32.xlu1 %v1045_v44 }
 0x343   :  { %v974_v45 = vpop.xlane.xlu0 %973 }
 0x344   :  { %v978_v47 = vsub.f32 %v970_v28, %v974_v45  ;;  %v3132_v28 = vld [vmem:[#allocation23 + $0x38] sm:$0xff]  ;;  %v3129_v45 = vld [vmem:[#allocation23 + $0x20] sm:$0xff] }
 0x345   :  { %1214 = vmatpush.bf16.msra.mxu2 %v3132_v28  ;;  %v2851_v28 = vld [vmem:[#allocation17 + $0x150] sm:$0xf] }
 0x346   :  { %v980_v48 = vmul.f32 1.442695, %v978_v47  ;;  %v3128_v47 = vld [vmem:[#allocation23 + $0x18] sm:$0xff] }
 0x348   :  { %3276 = vpow2.f32 %v980_v48  ;;  %v3127_v48 = vld [vmem:[#allocation23 + $0x10] sm:$0xff] }
 0x349   :  { %1215 = vmatpush.bf16.msra.mxu2 %v3131_v30  ;;  %v2868_v30 = vor.u32 %v3162_v22, %v2865_v27 }
 0x34b   :  { %v977_v49 = vpop.xlane.xlu0 %976 }
 0x34c   :  { %v979_v50 = vsub.f32 %v971_v32, %v977_v49  ;;  %v3126_v49 = vld [vmem:[#allocation23 + $0x8] sm:$0xff] }
 0x34d   :  { %1216 = vmatpush.bf16.msra.mxu2 %v3130_v31  ;;  %v3159_v31 = vld [vmem:[#allocation17 + $0x154] sm:$0xf] }
 0x34e   :  { %v3277_v51 = vpop.eup %3276  ;;  %v982_v52 = vmul.f32 1.442695, %v979_v50  ;;  %v3125_v50 = vld [vmem:[#allocation23] sm:$0xff] }
 0x34f   :  { %v984_v53 = vsel %vm604_vm0, %v3277_v51, 0.0 }
 0x350   :  { %3278 = vpow2.f32 %v982_v52  ;;  %985 = vadd.xlane.f32.xlu2 %v984_v53  ;;  %v3139_v52 = vld [vmem:[#allocation26 + $0x30] sm:$0xff]  ;;  %v3138_v53 = vld [vmem:[#allocation26 + $0x28] sm:$0xff] }
 0x351   :  { %1217 = vmatpush.bf16.msra.mxu2 %v3129_v45  ;;  %v3266_v45 = vld [vmem:[#allocation25] ss:$0 sm:$0xff] }
 0x353   :  { %v1044_v54 = vpop.xlane.xlu1 %1043 }
 0x354   :  { %v1048_v55 = vsub.f32 %v1040_v36, %v1044_v54  ;;  %v3265_v54 = vld [vmem:[#allocation22] ss:$0 sm:$0xff] }
 0x355   :  { %1218 = vmatpush.bf16.msra.mxu2 %v3128_v47 }
 0x356   :  { %v3279_v56 = vpop.eup %3278  ;;  %v1050_v57 = vmul.f32 1.442695, %v1048_v55  ;;  %v3263_v55 = vld [vmem:[#allocation16] ss:$0 sm:$0xff] }
 0x357   :  { %v987_v58 = vsel %vm604_vm0, %v3279_v56, 0.0 }
 0x358   :  { %3280 = vpow2.f32 %v1050_v57  ;;  %988 = vadd.xlane.f32.xlu2 %v987_v58 }
 0x359   :  { %1219 = vmatpush.bf16.msra.mxu2 %v3127_v48 }
 0x35b   :  { %v1047_v59 = vpop.xlane.xlu1 %1046 }
 0x35c   :  { %v1049_v60 = vsub.f32 %v1041_v42, %v1047_v59  ;;  %v752_v59 = vadd.f32 %v3263_v55, %v4129_v23 }
 0x35d   :  { %1220 = vmatpush.bf16.msra.mxu2 %v3126_v49 }
 0x35e   :  { %v3281_v61 = vpop.eup %3280  ;;  %v1052_v62 = vmul.f32 1.442695, %v1049_v60  ;;  %v754_v60 = vadd.f32 %v3263_v55, %v4131_v24  ;;  %v3153_v55 = vld [vmem:[#allocation17 + $0x124] sm:$0xf] }
 0x35f   :  { %v1054_v63 = vsel %vm604_vm0, %v3281_v61, 0.0 }
 0x360   :  { %3282 = vpow2.f32 %v1052_v62  ;;  %1055 = vadd.xlane.f32.xlu0 %v1054_v63 }
 0x361   :  { %1221 = vmatpush.bf16.msra.mxu2 %v3125_v50 }
 0x365   :  { %1728 = vmatpush.bf16.msrb.mxu2 %v2864_v26 }
 0x366   :  { %v3283_v0 = vpop.eup %3282 }
 0x367   :  { %v1057_v1 = vsel %vm604_vm0, %v3283_v0, 0.0 }
 0x368   :  { %1058 = vadd.xlane.f32.xlu1 %v1057_v1 }
 0x3c3   :  { %v986_v2 = vpop.xlane.xlu2 %985 }
 0x3c4   :  { %3284 = vrcp.f32 %v986_v2  ;;  %v757_v2 = vadd.f32 %v754_v60, %v4105_v41  ;;  %v3151_v60 = vld [vmem:[#allocation17 + $0x110] sm:$0xf0] }
 0x3ca   :  { %v3285_v4 = vpop.eup %3284 }
 0x3cb   :  { %v989_v3 = vpop.xlane.xlu2 %988  ;;  %v992_v6 = vmul.f32 %v3285_v4, %v3277_v51  ;;  %v3140_v51 = vld [vmem:[#allocation26 + $0x38] sm:$0xff] }
 0x3cc   :  { %3286 = vrcp.f32 %v989_v3  ;;  %1282 = vmatpush.bf16.msrb.mxu3 %v3140_v51 }
 0x3d0   :  { %1283 = vmatpush.bf16.msrb.mxu3 %v3139_v52 }
 0x3d2   :  { %v3287_v5 = vpop.eup %3286 }
 0x3d3   :  { %v993_v7 = vmul.f32 %v3287_v5, %v3279_v56  ;;  %v1056_v9 = vpop.xlane.xlu0 %1055  ;;  %v3137_v56 = vld [vmem:[#allocation26 + $0x20] sm:$0xff] }
 0x3d4   :  { %3288 = vrcp.f32 %v1056_v9  ;;  %1284 = vmatpush.bf16.msrb.mxu3 %v3138_v53  ;;  %v2827_v53 = vld [vmem:[#allocation17 + $0x120] sm:$0xf] }
 0x3d5   :  { %v994_v8 = vpack.c.bf16 %v993_v7, %v992_v6 }
 0x3d7   :  { %2612 = vmatmul.msk.bf16.vlgmr.msra.gmra.mxu1 %vm604_vm0, %v994_v8 }
 0x3d8   :  { %1285 = vmatpush.bf16.msrb.mxu3 %v3137_v56 }
 0x3da   :  { %v3289_v10 = vpop.eup %3288 }
 0x3db   :  { %v1059_v43 = vpop.xlane.xlu1 %1058  ;;  %v1062_v13 = vmul.f32 %v3289_v10, %v3281_v61  ;;  %v4161_v61 = vld [vmem:[%s4257_s18] sm:$0xff] }
 0x3dc   :  { %3290 = vrcp.f32 %v1059_v43  ;;  %v1154_v63 = vperm.slane %v4161_v61, 2  ;;  %v758_v1 = vperm.slane %v4161_v61, 0  ;;  %v1157_v24 = vperm.slane %v4161_v61, 3  ;;  %1286 = vmatpush.bf16.msrb.mxu3 %v3136_v16 }
 0x3dd   :  { %v761_v6 = vperm.slane %v4161_v61, 1  ;;  %v1298_v26 = vperm.slane %v4161_v61, 4 }
 0x3de   :  { %v760_v7 = vmul.f32 %v758_v1, %v757_v2  ;;  %v2803_v2 = vld [vmem:[#allocation17 + $0xf0] sm:$0xf] }
 0x3e0   :  { %1287 = vmatpush.bf16.msrb.mxu3 %v3135_v17  ;;  %v2781_v17 = vld [vmem:[#allocation17 + $0xcc] sm:$0xf0] }
 0x3e2   :  { %v3291_v12 = vpop.eup %3290 }
 0x3e3   :  { %v1063_v14 = vmul.f32 %v3291_v12, %v3283_v0  ;;  %v756_v0 = vadd.f32 %v752_v59, %v4103_v40  ;;  %v763_v12 = vadd.f32 %v761_v6, %v760_v7  ;;  %v2815_v59 = vld [vmem:[#allocation17 + $0x108] sm:$0xf]  ;;  %v3145_v7 = vld [vmem:[#allocation17 + $0xe0] sm:$0xf0] }
 0x3e4   :  { %1288 = vmatpush.bf16.msrb.mxu3 %v3134_v18 }
 0x3e5   :  { %v1064_v15 = vpack.c.bf16 %v1063_v14, %v1062_v13  ;;  %v759_v5 = vmul.f32 %v758_v1, %v756_v0  ;;  %v2817_v0 = vld [vmem:[#allocation17 + $0x114] sm:$0xf0] }
 0x3e7   :  { %2614 = vmatmul.msk.bf16.vlgmr.msrb.gmra.mxu1 %vm604_vm0, %v1064_v15  ;;  %v762_v10 = vadd.f32 %v761_v6, %v759_v5  ;;  %v2791_v6 = vld [vmem:[#allocation17 + $0xd8] sm:$0xf] }
 0x454   :  { %v1007_v29 = vpop.f32.mrf.mxu1 }
 0x455   :  { %v1012_v36 = vmul.f32 %v4121_v11, %v1007_v29  ;;  %v3160_v29 = vld [vmem:[#allocation17 + $0x158] sm:$0xf0] }
 0x45c   :  { %v1009_v32 = vpop.f32.mrf.mxu1 }
 0x45d   :  { %v1013_v37 = vmul.f32 %v4121_v11, %v1009_v32  ;;  %v2853_v32 = vld [vmem:[#allocation17 + $0x15c] sm:$0xf0] }
 0x464   :  { %v1077_v33 = vpop.f32.mrf.mxu1 }
 0x465   :  { %v1082_v34 = vmul.f32 %v4125_v19, %v1077_v33  ;;  %v2852_v33 = vor.u32 %v3160_v29, %v2851_v28 }
 0x467   :  { %v1084_v39 = vadd.f32 %v1082_v34, %v1012_v36  ;;  %v2856_v34 = vor.u32 %v3159_v31, %v2853_v32  ;;  %v3157_v36 = vld [vmem:[#allocation17 + $0x140] sm:$0xf0]  ;;  %1729 = vmatpush.bf16.msrb.mxu2 %v2852_v33 }
 0x46c   :  { %v1079_v35 = vpop.f32.mrf.mxu1 }
 0x46d   :  { %v1083_v38 = vmul.f32 %v4125_v19, %v1079_v35  ;;  %v2839_v35 = vld [vmem:[#allocation17 + $0x138] sm:$0xf] }
 0x46f   :  { %v1085_v42 = vadd.f32 %v1083_v38, %v1013_v37  ;;  %v3156_v37 = vld [vmem:[#allocation17 + $0x13c] sm:$0xf]  ;;  %v2841_v38 = vld [vmem:[#allocation17 + $0x144] sm:$0xf0] }
 0x471   :  { %v1086_v44 = vpack.c.bf16 %v1085_v42, %v1084_v39  ;;  %v2840_v39 = vor.u32 %v3157_v36, %v2839_v35  ;;  %v2844_v42 = vor.u32 %v3156_v37, %v2841_v38  ;;  %v3172_v35 = vld [vmem:[#allocation11 + $0x78] sm:$0xff]  ;;  %v3167_v38 = vld [vmem:[#allocation11 + $0x50] sm:$0xff] }
 0x472   :  { %v3168_v37 = vld [vmem:[#allocation11 + $0x58] sm:$0xff] }
 0x473   :  { %1146 = vmatmul.bf16.vlgmr.msra.gmra.mxu0 %v1086_v44  ;;  %1730 = vmatpush.bf16.msrb.mxu2 %v2840_v39  ;;  %v3166_v39 = vld [vmem:[#allocation11 + $0x48] sm:$0xff] }
 0x4f0   :  { %v1147_v57 = vpop.f32.mrf.mxu0 }
 0x4f1   :  { %v1148_v58 = vadd.f32 %v3265_v54, %v1147_v57  ;;  %v2829_v57 = vld [vmem:[#allocation17 + $0x12c] sm:$0xf0] }
 0x4f3   :  { %v1152_v62 = vadd.f32 %v1148_v58, %v4103_v40  ;;  %v2832_v58 = vor.u32 %v3153_v55, %v2829_v57  ;;  %v3152_v57 = vld [vmem:[#allocation17 + $0x118] sm:$0xf0] }
 0x4f5   :  { %v1155_v23 = vmul.f32 %v1154_v63, %v1152_v62  ;;  %v3150_v62 = vld [vmem:[#allocation17 + $0x10c] sm:$0xf] }
 0x4f6   :  { %v2820_v1 = vor.u32 %v3150_v62, %v2817_v0  ;;  %v3146_v0 = vld [vmem:[#allocation17 + $0xe8] sm:$0xf0] }
 0x4f7   :  { %v1158_v9 = vadd.f32 %v1157_v24, %v1155_v23  ;;  %v3147_v23 = vld [vmem:[#allocation17 + $0xf4] sm:$0xf] }
 0x4f8   :  { %v1149_v3 = vpop.f32.mrf.mxu0 }
 0x4f9   :  { %v1150_v4 = vadd.f32 %v3265_v54, %v1149_v3  ;;  %v4171_v13 = vadd.f32 %v1158_v9, %v762_v10  ;;  %v3154_v54 = vld [vmem:[#allocation17 + $0x128] sm:$0xf0]  ;;  %v3148_v3 = vld [vmem:[#allocation17 + $0xf8] sm:$0xf0]  ;;  %v2792_v9 = vor.u32 %v3145_v7, %v2791_v6  ;;  %v1377_v6 = vld [vmem:[#allocation19 + $0x3] sm:$0x7] }
 0x4fa   :  { %v2828_v56 = vor.u32 %v3154_v54, %v2827_v53  ;;  %v2835_v53 = vld [vmem:[#allocation17 + $0x128] sm:$0xf]  ;;  %v3155_v54 = vld [vmem:[#allocation17 + $0x130] sm:$0xf0] }
 0x4fb   :  { %v1153_v8 = vadd.f32 %v1150_v4, %v4105_v41  ;;  %v3133_v41 = vld [vmem:[#allocation26] sm:$0xff]  ;;  %v2805_v4 = vld [vmem:[#allocation17 + $0xfc] sm:$0xf0]  ;;  %v2836_v55 = vor.u32 %v3155_v54, %v2835_v53 }
 0x4fc   :  { %1289 = vmatpush.bf16.msrb.mxu3 %v3133_v41  ;;  %1731 = vmatpush.bf16.msrb.mxu2 %v2828_v56  ;;  %v2808_v5 = vor.u32 %v3147_v23, %v2805_v4  ;;  %v3267_v41 = vld [vmem:[#allocation28] ss:$0 sm:$0xff]  ;;  %v2823_v56 = vld [vmem:[#allocation17 + $0x110] sm:$0xf] }
 0x4fd   :  { %v1156_v43 = vmul.f32 %v1154_v63, %v1153_v8  ;;  %v2816_v63 = vor.u32 %v3151_v60, %v2815_v59  ;;  %v3144_v8 = vld [vmem:[#allocation17 + $0xdc] sm:$0xf]  ;;  %v2811_v59 = vld [vmem:[#allocation17 + $0xf8] sm:$0xf]  ;;  %v3149_v60 = vld [vmem:[#allocation17 + $0x100] sm:$0xf0] }
 0x4fe   :  { %v2812_v62 = vor.u32 %v3149_v60, %v2811_v59 }
 0x4ff   :  { %v1159_v40 = vadd.f32 %v1157_v24, %v1156_v43  ;;  %v2804_v24 = vor.u32 %v3148_v3, %v2803_v2  ;;  %v2793_v43 = vld [vmem:[#allocation17 + $0xe4] sm:$0xf0]  ;;  %v3143_v3 = vld [vmem:[#allocation17 + $0xd0] sm:$0xf0] }
 0x500   :  { %1742 = vmatpush.bf16.msra.mxu3 %v2868_v30  ;;  %1732 = vmatpush.bf16.msrb.mxu2 %v2816_v63  ;;  %v2796_v10 = vor.u32 %v3144_v8, %v2793_v43  ;;  %v1301_v30 = vperm.slane %v4161_v61, 5  ;;  %v3171_v61 = vld [vmem:[#allocation11 + $0x70] sm:$0xff]  ;;  %v2799_v63 = vld [vmem:[#allocation17 + $0xe0] sm:$0xf]  ;;  %v2787_v2 = vld [vmem:[#allocation17 + $0xc8] sm:$0xf] }
 0x501   :  { %v4173_v14 = vadd.f32 %v1159_v40, %v763_v12  ;;  %v2779_v12 = vld [vmem:[#allocation17 + $0xc0] sm:$0xf]  ;;  %v3142_v40 = vld [vmem:[#allocation17 + $0xc8] sm:$0xf0]  ;;  %v2788_v23 = vor.u32 %v3143_v3, %v2787_v2 }
 0x502   :  { %v2780_v16 = vor.u32 %v3142_v40, %v2779_v12  ;;  %v1594_v40 = vperm.slane %v1377_v6, 0 }
 0x503   :  { %v1162_v15 = vpack.c.bf16 %v4173_v14, %v4171_v13 }
 0x504   :  { %1743 = vmatpush.bf16.msra.mxu3 %v2856_v34  ;;  %1733 = vmatpush.bf16.msrb.mxu2 %v2804_v24 }
 0x505   :  { %1222 = vmatmul.bf16.vlgmr.msra.gmra.mxu2 %v1162_v15  ;;  %v3141_v15 = vld [vmem:[#allocation17 + $0xc4] sm:$0xf] }
 0x506   :  { %v2784_v18 = vor.u32 %v3141_v15, %v2781_v17 }
 0x508   :  { %1744 = vmatpush.bf16.msra.mxu3 %v2844_v42  ;;  %1734 = vmatpush.bf16.msrb.mxu2 %v2792_v9  ;;  %v2871_v42 = vld [vmem:[#allocation17 + $0x170] sm:$0xf]  ;;  %v1595_v9 = vperm.slane %v1377_v6, 1 }
 0x50c   :  { %1745 = vmatpush.bf16.msra.mxu3 %v2832_v58  ;;  %1735 = vmatpush.bf16.msrb.mxu2 %v2780_v16  ;;  %v2824_v58 = vor.u32 %v3152_v57, %v2823_v56 }
 0x510   :  { %1746 = vmatpush.bf16.msra.mxu3 %v2820_v1  ;;  %v2800_v1 = vor.u32 %v3146_v0, %v2799_v63 }
 0x514   :  { %1747 = vmatpush.bf16.msra.mxu3 %v2808_v5 }
 0x518   :  { %1748 = vmatpush.bf16.msra.mxu3 %v2796_v10 }
 0x51c   :  { %1749 = vmatpush.bf16.msra.mxu3 %v2784_v18  ;;  %v3180_v18 = vld [vmem:[#allocation14 + $0x78] sm:$0xff] }
 0x51d   :  { %1571 = vmatpush.bf16.msrb.mxu0 %v3180_v18 }
 0x588   :  { %v1223_v44 = vpop.f32.mrf.mxu2 }
 0x589   :  { %v1224_v47 = vadd.f32 %v3266_v45, %v1223_v44  ;;  %v3164_v44 = vld [vmem:[#allocation17 + $0x178] sm:$0xf0] }
 0x58b   :  { %v1228_v50 = vmax.f32 %v1224_v47, 0.0  ;;  %v2872_v47 = vor.u32 %v3164_v44, %v2871_v42 }
 0x590   :  { %v1225_v48 = vpop.f32.mrf.mxu2 }
 0x591   :  { %v1226_v49 = vadd.f32 %v3266_v45, %v1225_v48  ;;  %v3165_v45 = vld [vmem:[#allocation11 + $0x40] sm:$0xff]  ;;  %v2859_v48 = vld [vmem:[#allocation17 + $0x158] sm:$0xf] }
 0x593   :  { %v1229_v51 = vmax.f32 %v1226_v49, 0.0  ;;  %v3161_v49 = vld [vmem:[#allocation17 + $0x160] sm:$0xf0] }
 0x595   :  { %v1230_v52 = vpack.c.bf16 %v1229_v51, %v1228_v50  ;;  %v2847_v50 = vld [vmem:[#allocation17 + $0x140] sm:$0xf]  ;;  %v3158_v51 = vld [vmem:[#allocation17 + $0x148] sm:$0xf0] }
 0x597   :  { %1290 = vmatmul.bf16.vlgmr.msrb.gmra.mxu3 %v1230_v52  ;;  %v2848_v52 = vor.u32 %v3158_v51, %v2847_v50 }
 0x61a   :  { %v1291_v20 = vpop.f32.mrf.mxu3 }
 0x61b   :  { %v1292_v21 = vadd.f32 %v3267_v41, %v1291_v20 }
 0x61d   :  { %v1296_v22 = vadd.f32 %v1292_v21, %v4171_v13  ;;  %v3170_v13 = vld [vmem:[#allocation11 + $0x68] sm:$0xff]  ;;  %v3179_v21 = vld [vmem:[#allocation14 + $0x70] sm:$0xff] }
 0x61e   :  { %1572 = vmatpush.bf16.msrb.mxu0 %v3179_v21 }
 0x61f   :  { %v1299_v29 = vmul.f32 %v1298_v26, %v1296_v22 }
 0x621   :  { %v4181_v33 = vadd.f32 %v1301_v30, %v1299_v29 }
 0x622   :  { %v1293_v27 = vpop.f32.mrf.mxu3 }
 0x623   :  { %v1294_v28 = vadd.f32 %v3267_v41, %v1293_v27  ;;  %v3178_v27 = vld [vmem:[#allocation14 + $0x68] sm:$0xff] }
 0x624   :  { %1573 = vmatpush.bf16.msrb.mxu0 %v3178_v27 }
 0x625   :  { %v1297_v31 = vadd.f32 %v1294_v28, %v4173_v14  ;;  %v3169_v14 = vld [vmem:[#allocation11 + $0x60] sm:$0xff] }
 0x627   :  { %v1300_v32 = vmul.f32 %v1298_v26, %v1297_v31 }
 0x629   :  { %v4183_v34 = vadd.f32 %v1301_v30, %v1300_v32  ;;  %v3177_v30 = vld [vmem:[#allocation14 + $0x60] sm:$0xff] }
 0x62a   :  { %1574 = vmatpush.bf16.msrb.mxu0 %v3177_v30  ;;  %v3186_v30 = vld [vmem:[#allocation20 + $0x68] sm:$0xff] }
 0x62b   :  { %v4187_v36 = vpack.c.bf16 %v4183_v34, %v4181_v33 }
 0x62d   :  { %1444 = vmatpush.bf16.msra.mxu1 %v4187_v36  ;;  %1736 = vmatmul.bf16.vlgmr.msrb.gmra.mxu2 %v4187_v36 }
 0x62e   :  { %1750 = vmatmul.bf16.vlgmr.msra.gmra.mxu3 %v4187_v36 }
 0x630   :  { %2712 = vmatmul.msk.bf16.vlgmr.msra.gmra.mxu1 %vm604_vm0, %v4111_v46  ;;  %v2860_v46 = vor.u32 %v3161_v49, %v2859_v48 }
 0x631   :  { %1503 = vmatpush.bf16.msrb.mxu1 %v3172_v35 }
 0x635   :  { %1504 = vmatpush.bf16.msrb.mxu1 %v3171_v61  ;;  %v3176_v61 = vld [vmem:[#allocation14 + $0x58] sm:$0xff] }
 0x636   :  { %1575 = vmatpush.bf16.msrb.mxu0 %v3176_v61 }
 0x639   :  { %1505 = vmatpush.bf16.msrb.mxu1 %v3170_v13  ;;  %v3175_v13 = vld [vmem:[#allocation14 + $0x50] sm:$0xff] }
 0x63a   :  { %1576 = vmatpush.bf16.msrb.mxu0 %v3175_v13 }
 0x63d   :  { %1506 = vmatpush.bf16.msrb.mxu1 %v3169_v14  ;;  %v3174_v14 = vld [vmem:[#allocation14 + $0x48] sm:$0xff] }
 0x63e   :  { %1577 = vmatpush.bf16.msrb.mxu0 %v3174_v14 }
 0x641   :  { %1507 = vmatpush.bf16.msrb.mxu1 %v3168_v37  ;;  %v3173_v37 = vld [vmem:[#allocation14 + $0x40] sm:$0xff] }
 0x642   :  { %1578 = vmatpush.bf16.msrb.mxu0 %v3173_v37 }
 0x645   :  { %1508 = vmatpush.bf16.msrb.mxu1 %v3167_v38 }
 0x649   :  { %1509 = vmatpush.bf16.msrb.mxu1 %v3166_v39  ;;  %v3268_v39 = vld [vmem:[#allocation13 + $0x1] ss:$0 sm:$0xff] }
 0x64d   :  { %1510 = vmatpush.bf16.msrb.mxu1 %v3165_v45 }
 0x651   :  { %1756 = vmatpush.bf16.msra.mxu1 %v2872_v47 }
 0x655   :  { %1757 = vmatpush.bf16.msra.mxu1 %v2860_v46 }
 0x659   :  { %1758 = vmatpush.bf16.msra.mxu1 %v2848_v52  ;;  %v1596_v52 = vperm.slane %v1377_v6, 2 }
 0x65d   :  { %1759 = vmatpush.bf16.msra.mxu1 %v2836_v55 }
 0x661   :  { %1760 = vmatpush.bf16.msra.mxu1 %v2824_v58 }
 0x665   :  { %1761 = vmatpush.bf16.msra.mxu1 %v2812_v62 }
 0x669   :  { %1762 = vmatpush.bf16.msra.mxu1 %v2800_v1 }
 0x66d   :  { %1763 = vmatpush.bf16.msra.mxu1 %v2788_v23 }
 0x6ad   :  { %v1446_v24 = vpop.f32.mrf.mxu1 }
 0x6ae   :  { %v1447_v8 = vadd.f32 %v1446_v24, %v4181_v33 }
 0x6b0   :  { %v1737_v4 = vpop.f32.mrf.mxu2 }
 0x6b1   :  { %v1751_v5 = vpop.f32.mrf.mxu3  ;;  %v1738_v22 = vadd.f32 %v1737_v4, %v1594_v40 }
 0x6b2   :  { %v1752_v16 = vadd.f32 %v1751_v5, %v1595_v9 }
 0x6b3   :  { %v1837_v28 = vmul.f32 %v4125_v19, %v1738_v22  ;;  %v1772_v32 = vmul.f32 %v4121_v11, %v1738_v22 }
 0x6b5   :  { %v1448_v7 = vpop.f32.mrf.mxu1 }
 0x6b6   :  { %v1449_v43 = vadd.f32 %v1448_v7, %v4183_v34 }
 0x6b8   :  { %v1451_v10 = vpack.c.bf16 %v1449_v43, %v1447_v8  ;;  %v1739_v12 = vpop.f32.mrf.mxu2 }
 0x6b9   :  { %v1753_v15 = vpop.f32.mrf.mxu3  ;;  %v1740_v41 = vadd.f32 %v1739_v12, %v1594_v40 }
 0x6ba   :  { %v1754_v17 = vadd.f32 %v1753_v15, %v1595_v9  ;;  %1511 = vmatmul.bf16.vlgmr.msrb.gmra.mxu1 %v1451_v10 }
 0x6bb   :  { %v1838_v26 = vmul.f32 %v4125_v19, %v1740_v41  ;;  %v1773_v31 = vmul.f32 %v4121_v11, %v1740_v41 }
 0x6bc   :  { %v1770_v20 = vpack.c.bf16 %v1754_v17, %v1752_v16 }
 0x6bd   :  { %v1839_v29 = vpack.c.bf16 %v1838_v26, %v1837_v28  ;;  %v1774_v35 = vpack.c.bf16 %v1773_v31, %v1772_v32  ;;  %v3188_v28 = vld [vmem:[#allocation20 + $0x78] sm:$0xff] }
 0x6be   :  { %1782 = vmatpush.bf16.xpose.msrb.mxu1 %v1770_v20  ;;  %1847 = vmatpush.bf16.xpose.msrb.mxu3 %v1770_v20 }
 0x6c5   :  { %1848 = vmatmul.bf16.vlgmr.msrb.gmra.mxu3 %v1839_v29  ;;  %v3187_v29 = vld [vmem:[#allocation20 + $0x70] sm:$0xff] }
 0x6ca   :  { %1764 = vmatmul.bf16.vlgmr.msra.gmra.mxu1 %v4187_v36 }
 0x6da   :  { %1783 = vmatmul.bf16.vlgmr.msrb.gmra.mxu1 %v1774_v35 }
 0x737   :  { %v1512_v38 = vpop.f32.mrf.mxu1 }
 0x738   :  { %v1513_v42 = vadd.f32 %v3268_v39, %v1512_v38 }
 0x73a   :  { %v1517_v36 = vmax.f32 %v1513_v42, 0.0 }
 0x73f   :  { %v1514_v44 = vpop.f32.mrf.mxu1 }
 0x740   :  { %v1515_v45 = vadd.f32 %v3268_v39, %v1514_v44 }
 0x742   :  { %v1518_v47 = vmax.f32 %v1515_v45, 0.0 }
 0x744   :  { %v1519_v48 = vpack.c.bf16 %v1518_v47, %v1517_v36 }
 0x746   :  { %1579 = vmatmul.bf16.vlgmr.msrb.gmra.mxu0 %v1519_v48  ;;  %v3185_v48 = vld [vmem:[#allocation20 + $0x60] sm:$0xff] }
 0x747   :  { %v1765_v49 = vpop.f32.mrf.mxu1 }
 0x748   :  { %v1849_v46 = vpop.f32.mrf.mxu3  ;;  %v1766_v55 = vadd.f32 %v1765_v49, %v1596_v52  ;;  %v3184_v49 = vld [vmem:[#allocation20 + $0x58] sm:$0xff] }
 0x749   :  { %v1854_v50 = vmul.f32 0.25, %v1849_v46  ;;  %v3183_v46 = vld [vmem:[#allocation20 + $0x50] sm:$0xff] }
 0x74b   :  { %v1856_v51 = vadd.f32 %v4136_v25, %v1854_v50  ;;  %v3182_v50 = vld [vmem:[#allocation20 + $0x48] sm:$0xff] }
 0x74d   :  { %v1858_v53 = vsel %vm604_vm0, %v1856_v51, -inf }
 0x74e   :  { %1859 = vmax.xlane.f32.xlu1 %v1858_v53  ;;  %v3196_v53 = vld [vmem:[#allocation23 + $0x78] sm:$0xff] }
 0x74f   :  { %v1767_v54 = vpop.f32.mrf.mxu1  ;;  %2030 = vmatpush.bf16.msra.mxu3 %v3196_v53  ;;  %v3272_v53 = vld [vmem:[#allocation28 + $0x1] ss:$0 sm:$0xff] }
 0x750   :  { %v1768_v56 = vadd.f32 %v1767_v54, %v1596_v52  ;;  %v1851_v60 = vpop.f32.mrf.mxu3  ;;  %v3181_v52 = vld [vmem:[#allocation20 + $0x40] sm:$0xff]  ;;  %v3195_v54 = vld [vmem:[#allocation23 + $0x70] sm:$0xff] }
 0x751   :  { %v1855_v63 = vmul.f32 0.25, %v1851_v60 }
 0x752   :  { %v1771_v57 = vpack.c.bf16 %v1768_v56, %v1766_v55  ;;  %v3194_v56 = vld [vmem:[#allocation23 + $0x68] sm:$0xff] }
 0x753   :  { %v1857_v3 = vadd.f32 %v4136_v25, %v1855_v63  ;;  %2031 = vmatpush.bf16.msra.mxu3 %v3195_v54 }
 0x754   :  { %1826 = vmatpush.bf16.msra.mxu2 %v1771_v57  ;;  %1891 = vmatpush.bf16.msra.mxu0 %v1771_v57 }
 0x755   :  { %v1861_v24 = vsel %vm604_vm0, %v1857_v3, -inf }
 0x757   :  { %v1784_v58 = vpop.f32.mrf.mxu1  ;;  %2032 = vmatpush.bf16.msra.mxu3 %v3194_v56 }
 0x758   :  { %v1789_v59 = vmul.f32 0.25, %v1784_v58  ;;  %1954 = vmatpush.bf16.msrb.mxu2 %v3188_v28 }
 0x75a   :  { %v1791_v62 = vadd.f32 %v4136_v25, %v1789_v59 }
 0x75c   :  { %v1793_v0 = vsel %vm604_vm0, %v1791_v62, -inf  ;;  %1955 = vmatpush.bf16.msrb.mxu2 %v3187_v29 }
 0x75d   :  { %1794 = vmax.xlane.f32.xlu2 %v1793_v0 }
 0x75f   :  { %v1786_v1 = vpop.f32.mrf.mxu1 }
 0x760   :  { %v1790_v2 = vmul.f32 0.25, %v1786_v1  ;;  %1956 = vmatpush.bf16.msrb.mxu2 %v3186_v30 }
 0x762   :  { %v1792_v23 = vadd.f32 %v4136_v25, %v1790_v2 }
 0x764   :  { %v1796_v4 = vsel %vm604_vm0, %v1792_v23, -inf  ;;  %1957 = vmatpush.bf16.msrb.mxu2 %v3185_v48  ;;  %v3271_v48 = vld [vmem:[#allocation25 + $0x1] ss:$0 sm:$0xff] }
 0x765   :  { %1862 = vmax.xlane.f32.xlu2 %v1861_v24  ;;  %1797 = vmax.xlane.f32.xlu0 %v1796_v4  ;;  %v3193_v24 = vld [vmem:[#allocation23 + $0x60] sm:$0xff]  ;;  %v3192_v4 = vld [vmem:[#allocation23 + $0x58] sm:$0xff] }
 0x766   :  { %2033 = vmatpush.bf16.msra.mxu3 %v3193_v24  ;;  %v2120_v24 = vld [vmem:[#allocation7] sm:$0xf] }
 0x768   :  { %1958 = vmatpush.bf16.msrb.mxu2 %v3184_v49 }
 0x76a   :  { %2034 = vmatpush.bf16.msra.mxu3 %v3192_v4  ;;  %v3211_v4 = vld [vmem:[#allocation29 + $0x30] sm:$0xff] }
 0x76c   :  { %1959 = vmatpush.bf16.msrb.mxu2 %v3183_v46 }
 0x770   :  { %1960 = vmatpush.bf16.msrb.mxu2 %v3182_v50 }
 0x774   :  { %1961 = vmatpush.bf16.msrb.mxu2 %v3181_v52 }
 0x7c1   :  { %v1860_v5 = vpop.xlane.xlu1 %1859 }
 0x7c2   :  { %v1864_v6 = vsub.f32 %v1856_v51, %v1860_v5  ;;  %v3191_v5 = vld [vmem:[#allocation23 + $0x50] sm:$0xff] }
 0x7c3   :  { %v1580_v51 = vpop.f32.mrf.mxu0  ;;  %2035 = vmatpush.bf16.msra.mxu3 %v3191_v5  ;;  %v3210_v5 = vld [vmem:[#allocation29 + $0x28] sm:$0xff] }
 0x7c4   :  { %v1866_v7 = vmul.f32 1.442695, %v1864_v6  ;;  %v3190_v6 = vld [vmem:[#allocation23 + $0x48] sm:$0xff] }
 0x7c6   :  { %3292 = vpow2.f32 %v1866_v7  ;;  %v3189_v7 = vld [vmem:[#allocation23 + $0x40] sm:$0xff] }
 0x7c7   :  { %2036 = vmatpush.bf16.msra.mxu3 %v3190_v6  ;;  %v3209_v6 = vld [vmem:[#allocation29 + $0x20] sm:$0xff] }
 0x7cb   :  { %v1582_v55 = vpop.f32.mrf.mxu0  ;;  %2037 = vmatpush.bf16.msra.mxu3 %v3189_v7  ;;  %v3208_v7 = vld [vmem:[#allocation29 + $0x18] sm:$0xff] }
 0x7cc   :  { %v3293_v8 = vpop.eup %3292 }
 0x7cd   :  { %v1870_v9 = vsel %vm604_vm0, %v3293_v8, 0.0 }
 0x7ce   :  { %1871 = vadd.xlane.f32.xlu2 %v1870_v9  ;;  %v3203_v9 = vld [vmem:[#allocation26 + $0x70] sm:$0xff] }
 0x7d0   :  { %v1795_v43 = vpop.xlane.xlu2 %1794 }
 0x7d1   :  { %v1799_v10 = vsub.f32 %v1791_v62, %v1795_v43  ;;  %v3269_v43 = vld [vmem:[#allocation16 + $0x1] ss:$0 sm:$0xff] }
 0x7d3   :  { %v1801_v12 = vmul.f32 1.442695, %v1799_v10  ;;  %v3201_v10 = vld [vmem:[#allocation26 + $0x60] sm:$0xff] }
 0x7d5   :  { %3294 = vpow2.f32 %v1801_v12 }
 0x7d8   :  { %v1863_v40 = vpop.xlane.xlu2 %1862  ;;  %v1798_v25 = vpop.xlane.xlu0 %1797 }
 0x7d9   :  { %v1865_v15 = vsub.f32 %v1857_v3, %v1863_v40  ;;  %v1800_v16 = vsub.f32 %v1792_v23, %v1798_v25  ;;  %v1581_v25 = vadd.f32 %v3269_v43, %v1580_v51 }
 0x7db   :  { %v3295_v17 = vpop.eup %3294  ;;  %v1868_v18 = vmul.f32 1.442695, %v1865_v15  ;;  %v1803_v41 = vmul.f32 1.442695, %v1800_v16  ;;  %v1583_v15 = vadd.f32 %v3269_v43, %v1582_v55  ;;  %v2711_v16 = vld [vmem:[%s4257_s18 + $0x8] sm:$0xff]  ;;  %v3219_v43 = vld [vmem:[#allocation31 + $0x30] sm:$0xff] }
 0x7dc   :  { %v1805_v20 = vsel %vm604_vm0, %v3295_v17, 0.0  ;;  %v1590_v30 = vperm.slane %v2711_v16, 1 }
 0x7dd   :  { %3296 = vpow2.f32 %v1868_v18  ;;  %1806 = vadd.xlane.f32.xlu0 %v1805_v20  ;;  %v1970_v18 = vperm.slane %v2711_v16, 2  ;;  %v1587_v20 = vperm.slane %v2711_v16, 0 }
 0x7de   :  { %3298 = vpow2.f32 %v1803_v41  ;;  %v1585_v41 = vadd.f32 %v1581_v25, %v4181_v33  ;;  %v3215_v25 = vld [vmem:[#allocation31 + $0x10] sm:$0xff] }
 0x7e0   :  { %v1588_v29 = vmul.f32 %v1587_v20, %v1585_v41  ;;  %v3213_v41 = vld [vmem:[#allocation31] sm:$0xff] }
 0x7e3   :  { %v3297_v21 = vpop.eup %3296 }
 0x7e4   :  { %v3299_v22 = vpop.eup %3298  ;;  %v1873_v26 = vsel %vm604_vm0, %v3297_v21, 0.0 }
 0x7e5   :  { %1874 = vadd.xlane.f32.xlu0 %v1873_v26  ;;  %v1808_v27 = vsel %vm604_vm0, %v3299_v22, 0.0 }
 0x7e6   :  { %1809 = vadd.xlane.f32.xlu1 %v1808_v27  ;;  %v1973_v27 = vperm.slane %v2711_v16, 3 }
 0x841   :  { %v1872_v32 = vpop.xlane.xlu2 %1871 }
 0x842   :  { %3300 = vrcp.f32 %v1872_v32 }
 0x848   :  { %v3301_v13 = vpop.eup %3300 }
 0x849   :  { %v1878_v39 = vmul.f32 %v3301_v13, %v3293_v8  ;;  %v3204_v8 = vld [vmem:[#allocation26 + $0x78] sm:$0xff]  ;;  %v1591_v13 = vadd.f32 %v1590_v30, %v1588_v29  ;;  %v3273_v29 = vld [vmem:[%s4259_s20] ss:$0 sm:$0xff] }
 0x84a   :  { %2098 = vmatpush.bf16.msra.mxu1 %v3204_v8  ;;  %v3207_v8 = vld [vmem:[#allocation29 + $0x10] sm:$0xff] }
 0x84e   :  { %2099 = vmatpush.bf16.msra.mxu1 %v3203_v9  ;;  %v3206_v9 = vld [vmem:[#allocation29 + $0x8] sm:$0xff] }
 0x850   :  { %v1807_v31 = vpop.xlane.xlu0 %1806 }
 0x851   :  { %3302 = vrcp.f32 %v1807_v31 }
 0x857   :  { %v3303_v14 = vpop.eup %3302 }
 0x858   :  { %v1875_v35 = vpop.xlane.xlu0 %1874  ;;  %v1813_v44 = vmul.f32 %v3303_v14, %v3295_v17 }
 0x859   :  { %v1810_v61 = vpop.xlane.xlu1 %1809  ;;  %3304 = vrcp.f32 %v1875_v35 }
 0x85a   :  { %3306 = vrcp.f32 %v1810_v61 }
 0x85f   :  { %v3305_v37 = vpop.eup %3304 }
 0x860   :  { %v3307_v38 = vpop.eup %3306  ;;  %v1879_v42 = vmul.f32 %v3305_v37, %v3297_v21  ;;  %v1586_v21 = vadd.f32 %v1583_v15, %v4183_v34 }
 0x861   :  { %v1814_v45 = vmul.f32 %v3307_v38, %v3299_v22 }
 0x862   :  { %v1880_v36 = vpack.c.bf16 %v1879_v42, %v1878_v39  ;;  %v1589_v31 = vmul.f32 %v1587_v20, %v1586_v21  ;;  %v3200_v42 = vld [vmem:[#allocation26 + $0x58] sm:$0xff] }
 0x863   :  { %v1815_v47 = vpack.c.bf16 %v1814_v45, %v1813_v44  ;;  %v3199_v44 = vld [vmem:[#allocation26 + $0x50] sm:$0xff]  ;;  %v3198_v45 = vld [vmem:[#allocation26 + $0x48] sm:$0xff]  ;;  %v3228_v20 = vld [vmem:[#allocation32 + $0x38] sm:$0xff] }
 0x864   :  { %2874 = vmatmul.msk.bf16.vlgmr.msra.gmra.mxu0 %vm604_vm0, %v1880_v36  ;;  %v1592_v14 = vadd.f32 %v1590_v30, %v1589_v31  ;;  %v3197_v36 = vld [vmem:[#allocation26 + $0x40] sm:$0xff]  ;;  %2373 = vmatpush.bf16.msrb.mxu3 %v3228_v20  ;;  %v3227_v21 = vld [vmem:[#allocation32 + $0x30] sm:$0xff] }
 0x865   :  { %2873 = vmatmul.msk.bf16.vlgmr.msra.gmra.mxu2 %vm604_vm0, %v1815_v47 }
 0x868   :  { %2374 = vmatpush.bf16.msrb.mxu3 %v3227_v21 }
 0x8e1   :  { %v1893_v57 = vpop.f32.mrf.mxu0 }
 0x8e2   :  { %v1898_v63 = vmul.f32 %v4125_v19, %v1893_v57  ;;  %v2114_v57 = vperm.slane %v2711_v16, 4 }
 0x8e8   :  { %v1828_v58 = vpop.f32.mrf.mxu2 }
 0x8e9   :  { %v1895_v59 = vpop.f32.mrf.mxu0  ;;  %v1833_v60 = vmul.f32 %v4121_v11, %v1828_v58 }
 0x8ea   :  { %v1899_v0 = vmul.f32 %v4125_v19, %v1895_v59  ;;  %v3202_v19 = vld [vmem:[#allocation26 + $0x68] sm:$0xff] }
 0x8eb   :  { %v1900_v2 = vadd.f32 %v1898_v63, %v1833_v60  ;;  %2100 = vmatpush.bf16.msra.mxu1 %v3202_v19  ;;  %v3205_v19 = vld [vmem:[#allocation29] sm:$0xff] }
 0x8ef   :  { %2101 = vmatpush.bf16.msra.mxu1 %v3201_v10  ;;  %v3218_v10 = vld [vmem:[#allocation31 + $0x28] sm:$0xff] }
 0x8f0   :  { %v1830_v62 = vpop.f32.mrf.mxu2 }
 0x8f1   :  { %v1834_v1 = vmul.f32 %v4121_v11, %v1830_v62  ;;  %v3270_v11 = vld [vmem:[#allocation22 + $0x1] ss:$0 sm:$0xff]  ;;  %v2117_v62 = vperm.slane %v2711_v16, 5 }
 0x8f3   :  { %v1901_v3 = vadd.f32 %v1899_v0, %v1834_v1  ;;  %2102 = vmatpush.bf16.msra.mxu1 %v3200_v42 }
 0x8f5   :  { %v1902_v23 = vpack.c.bf16 %v1901_v3, %v1900_v2  ;;  %v3212_v3 = vld [vmem:[#allocation29 + $0x38] sm:$0xff] }
 0x8f7   :  { %1962 = vmatmul.bf16.vlgmr.msrb.gmra.mxu2 %v1902_v23  ;;  %2103 = vmatpush.bf16.msra.mxu1 %v3199_v44 }
 0x8fb   :  { %2104 = vmatpush.bf16.msra.mxu1 %v3198_v45  ;;  %v3275_v45 = vld [vmem:[%s4287_s8] ss:$0 sm:$0xff] }
 0x8ff   :  { %2105 = vmatpush.bf16.msra.mxu1 %v3197_v36 }
 0x97a   :  { %v1963_v12 = vpop.f32.mrf.mxu2 }
 0x97b   :  { %v1964_v40 = vadd.f32 %v3270_v11, %v1963_v12  ;;  %v3217_v12 = vld [vmem:[#allocation31 + $0x20] sm:$0xff] }
 0x97d   :  { %v1968_v17 = vadd.f32 %v1964_v40, %v4181_v33  ;;  %v3216_v40 = vld [vmem:[#allocation31 + $0x18] sm:$0xff] }
 0x97f   :  { %v1971_v26 = vmul.f32 %v1970_v18, %v1968_v17 }
 0x981   :  { %v1974_v35 = vadd.f32 %v1973_v27, %v1971_v26  ;;  %v3225_v26 = vld [vmem:[#allocation32 + $0x20] sm:$0xff] }
 0x982   :  { %v1965_v22 = vpop.f32.mrf.mxu2 }
 0x983   :  { %v1966_v28 = vadd.f32 %v3270_v11, %v1965_v22  ;;  %v1976_v38 = vadd.f32 %v1974_v35, %v1591_v13  ;;  %v3220_v11 = vld [vmem:[#allocation31 + $0x38] sm:$0xff]  ;;  %v3226_v22 = vld [vmem:[#allocation32 + $0x28] sm:$0xff] }
 0x984   :  { %2290 = vmatpush.bf16.msra.mxu2 %v3220_v11  ;;  %2375 = vmatpush.bf16.msrb.mxu3 %v3226_v22  ;;  %v3222_v13 = vld [vmem:[#allocation32 + $0x8] sm:$0xff] }
 0x985   :  { %v1969_v32 = vadd.f32 %v1966_v28, %v4183_v34  ;;  %v3223_v28 = vld [vmem:[#allocation32 + $0x10] sm:$0xff] }
 0x987   :  { %v1972_v61 = vmul.f32 %v1970_v18, %v1969_v32  ;;  %v3214_v18 = vld [vmem:[#allocation31 + $0x8] sm:$0xff] }
 0x988   :  { %2291 = vmatpush.bf16.msra.mxu2 %v3219_v43  ;;  %2376 = vmatpush.bf16.msrb.mxu3 %v3225_v26 }
 0x989   :  { %v1975_v37 = vadd.f32 %v1973_v27, %v1972_v61  ;;  %v3224_v27 = vld [vmem:[#allocation32 + $0x18] sm:$0xff] }
 0x98b   :  { %v1977_v39 = vadd.f32 %v1975_v37, %v1592_v14  ;;  %v3221_v14 = vld [vmem:[#allocation32] sm:$0xff]  ;;  %v3274_v37 = vld [vmem:[%s4261_s22] ss:$0 sm:$0xff] }
 0x98c   :  { %2292 = vmatpush.bf16.msra.mxu2 %v3218_v10  ;;  %2377 = vmatpush.bf16.msrb.mxu3 %v3224_v27 }
 0x98d   :  { %v1978_v33 = vpack.c.bf16 %v1977_v39, %v1976_v38 }
 0x98f   :  { %2038 = vmatmul.bf16.vlgmr.msra.gmra.mxu3 %v1978_v33 }
 0x990   :  { %2293 = vmatpush.bf16.msra.mxu2 %v3217_v12  ;;  %2378 = vmatpush.bf16.msrb.mxu3 %v3223_v28 }
 0x994   :  { %2294 = vmatpush.bf16.msra.mxu2 %v3216_v40  ;;  %2379 = vmatpush.bf16.msrb.mxu3 %v3222_v13 }
 0x998   :  { %2295 = vmatpush.bf16.msra.mxu2 %v3215_v25  ;;  %2380 = vmatpush.bf16.msrb.mxu3 %v3221_v14 }
 0x99c   :  { %2296 = vmatpush.bf16.msra.mxu2 %v3214_v18 }
 0x9a0   :  { %2297 = vmatpush.bf16.msra.mxu2 %v3213_v41 }
 0xa12   :  { %v2039_v47 = vpop.f32.mrf.mxu3 }
 0xa13   :  { %v2040_v34 = vadd.f32 %v3271_v48, %v2039_v47 }
 0xa15   :  { %v2044_v50 = vmax.f32 %v2040_v34, 0.0 }
 0xa1a   :  { %v2041_v49 = vpop.f32.mrf.mxu3 }
 0xa1b   :  { %v2042_v46 = vadd.f32 %v3271_v48, %v2041_v49 }
 0xa1d   :  { %v2045_v51 = vmax.f32 %v2042_v46, 0.0 }
 0xa1f   :  { %v2046_v52 = vpack.c.bf16 %v2045_v51, %v2044_v50 }
 0xa21   :  { %2106 = vmatmul.bf16.vlgmr.msra.gmra.mxu1 %v2046_v52 }
 0xa9e   :  { %v2107_v54 = vpop.f32.mrf.mxu1 }
 0xa9f   :  { %v2108_v55 = vadd.f32 %v3272_v53, %v2107_v54 }
 0xaa1   :  { %v2112_v56 = vadd.f32 %v2108_v55, %v1976_v38 }
 0xaa3   :  { %v2115_v60 = vmul.f32 %v2114_v57, %v2112_v56 }
 0xaa5   :  { %v2118_v1 = vadd.f32 %v2117_v62, %v2115_v60 }
 0xaa6   :  { %v2109_v58 = vpop.f32.mrf.mxu1 }
 0xaa7   :  { %v2110_v59 = vadd.f32 %v3272_v53, %v2109_v58 }
 0xaa9   :  { %v2113_v63 = vadd.f32 %v2110_v59, %v1977_v39 }
 0xaab   :  { %v2116_v0 = vmul.f32 %v2114_v57, %v2113_v63 }
 0xaad   :  { %v2119_v2 = vadd.f32 %v2117_v62, %v2116_v0 }
 0xaaf   :  { %v2121_v23 = vpack.c.bf16 %v2119_v2, %v2118_v1 }
 0xab1   :  { %2132 = vmatpush.bf16.msrb.mxu0 %v2121_v23 }
 0xab4   :  { %2971 = vmatmul.msk.bf16.vlgmr.msrb.gmra.mxu0 %vm604_vm0, %v2120_v24 }
 0xab5   :  { %2207 = vmatpush.bf16.msra.mxu0 %v3212_v3 }
 0xab9   :  { %2208 = vmatpush.bf16.msra.mxu0 %v3211_v4 }
 0xabd   :  { %2209 = vmatpush.bf16.msra.mxu0 %v3210_v5 }
 0xac1   :  { %2210 = vmatpush.bf16.msra.mxu0 %v3209_v6 }
 0xac5   :  { %2211 = vmatpush.bf16.msra.mxu0 %v3208_v7 }
 0xac9   :  { %2212 = vmatpush.bf16.msra.mxu0 %v3207_v8 }
 0xacd   :  { %2213 = vmatpush.bf16.msra.mxu0 %v3206_v9 }
 0xad1   :  { %2214 = vmatpush.bf16.msra.mxu0 %v3205_v19 }
 0xb31   :  { %v2134_v15 = vpop.f32.mrf.mxu0 }
 0xb32   :  { %v2154_v16 = vpack.c.bf16 %v2134_v15, %v2134_v15 }
 0xb34   :  { %2215 = vmatmul.bf16.vlgmr.msra.gmra.mxu0 %v2154_v16 }
 0xb39   :  { %v2136_v17 = vpop.f32.mrf.mxu0 }
 0xbb1   :  { %v2216_v30 = vpop.f32.mrf.mxu0 }
 0xbb2   :  { %v2217_v31 = vadd.f32 %v3273_v29, %v2216_v30 }
 0xbb4   :  { %v2220_v32 = vmax.f32 %v2217_v31, 0.0 }
 0xbb6   :  { %v2237_v35 = vpack.c.bf16 %v2220_v32, %v2220_v32 }
 0xbb8   :  { %2298 = vmatmul.bf16.vlgmr.msra.gmra.mxu2 %v2237_v35 }
 0xbb9   :  { %v2218_v61 = vpop.f32.mrf.mxu0 }
 0xc3b   :  { %v2299_v38 = vpop.f32.mrf.mxu2 }
 0xc3c   :  { %v2300_v39 = vadd.f32 %v3274_v37, %v2299_v38 }
 0xc3e   :  { %v2303_v33 = vmax.f32 %v2300_v39, 0.0 }
 0xc40   :  { %v2320_v42 = vpack.c.bf16 %v2303_v33, %v2303_v33 }
 0xc42   :  { %2381 = vmatmul.bf16.vlgmr.msrb.gmra.mxu3 %v2320_v42 }
 0xc43   :  { %v2301_v44 = vpop.f32.mrf.mxu2 }
 0xcc5   :  { %v2382_v36 = vpop.f32.mrf.mxu3 }
 0xcc6   :  { %v2383_v47 = vadd.f32 %v3275_v45, %v2382_v36 }
 0xcc8   :  { %2386 = vst [vmem:[#allocation34] sm:$0xff] %v2383_v47 }
 0xcc9   :  { %2397 = dma.vmem_to_hbm [thread:$0]  %s2393_s13, 128, %s2395_s15, [#allocation4]  }
 0xccd   :  { %v2384_v48 = vpop.f32.mrf.mxu3 }
 0xcce   :  { %3834 = dma.done.wait [#allocation4], 128  }
 0xccf   :  { %3835 = vsyncadd [#allocation4], 4294967168 }
 0xcd0   :  { %2402 = vsyncpa [#allocation3], 1 }
 0xcd1   :  { %2403 = vsyncpa [#allocation6], 1 }
 0xcd2   :  { %2404 = vsyncpa [#allocation9], 1 }
 0xcd3   :  { %2405 = vsyncpa [#allocation12], 1 }
 0xcd4   :  { %2406 = vsyncpa [#allocation15], 1 }
 0xcd5   :  { %2407 = vsyncpa [#allocation18], 1 }
 0xcd6   :  { %2408 = vsyncpa [#allocation21], 1 }
 0xcd7   :  { %2409 = vsyncpa [#allocation24], 1 }
 0xcd8   :  { %2410 = vsyncpa [#allocation27], 1 }
 0xcd9   :  { %2411 = vsyncpa [#allocation30], 1 }
 0xcda   :  { %2412 = vsyncpa [#allocation33], 1 }
 0xcdb   :  { %2413 = vsyncpa [#allocation4], 1 }

</bundles_post_ra>
